<compile_context>
chip_gen: v7x
topology: tpu7x:2x2x1
jax: 0.10.0
libtpu: 0.0.40
codegen_flags: <defaults>
</compile_context>

<pallas_src>
import numpy as np

import jax
import jax.numpy as jnp
from jax.experimental import pallas as pl
from jax.experimental.pallas import tpu as pltpu

# -------------------- config (small synthetic stand-ins) --------------------
JOINT_NUM = 8
ROOT_JOINT_IDX = 0
ID_CODE_DIM = 8
POSE_CODE_DIM = 16

C_IN = 3 + 1 + 1          # img + depthmap + mask channels
C_BB = 128                # stand-in for the backbone's 2048 output channels
C_FEAT = 64               # stand-in for the 512-channel 1x1 conv output
IMG_SIZE = 16             # input spatial size
FEAT_SIZE = 8             # feature-map spatial size (after 2x2 avg pool)

D_JOINT = JOINT_NUM * (C_FEAT + 2) + ID_CODE_DIM + 6      # 542
D_ROOT = C_FEAT + 2 + ID_CODE_DIM + 6                     # 80

D_JOINT_PAD = ((D_JOINT + 127) // 128) * 128              # 640 (lane-aligned K)
D_ROOT_PAD = 128

# fused joint-head output packing:
#   [root_pose(6) | hand_pose(42) | root_pose_code(6) | pose_code(16)] = 70
HEADS_OUT = 6 + (JOINT_NUM - 1) * 6 + 6 + POSE_CODE_DIM   # 70
HEADS_OUT_PAD = 128                                       # lane-dense store
HIDDEN = 128                                              # root-trans MLP hidden
MLP_OUT_PAD = 128


# ------------------------------ Pallas kernels -------------------------------
def _backbone_sample_kernel(x_ref, bbw_ref, bbb_ref, pool_ref, cw_ref, cs_ref,
                            wmat_ref, o_ref):
    # per-batch fused: backbone 1x1 conv + ReLU
    bb = jnp.dot(x_ref[...], bbw_ref[...], preferred_element_type=jnp.float32)
    bb = jnp.maximum(bb + bbb_ref[...], 0.0)                       # (HW, C_BB)
    # 2x2 average pool as a constant-matrix MXU matmul
    pooled = jnp.dot(pool_ref[...], bb,
                     preferred_element_type=jnp.float32)           # (HWF, C_BB)
    # conv 1x1 with folded (bias + eval-mode BN) shift, then ReLU
    feat = jnp.dot(pooled, cw_ref[...], preferred_element_type=jnp.float32)
    feat = jnp.maximum(feat + cs_ref[...], 0.0)                    # (HWF, C_FEAT)
    # grid_sample: dense bilinear-weight matmul (J, HWF) @ (HWF, C_FEAT)
    o_ref[...] = jnp.dot(wmat_ref[...], feat,
                         preferred_element_type=jnp.float32)


def backbone_sample_pallas(x, bb_w, bb_b, pool_mat, conv_w, conv_shift, wmat):
    b, hw, cin = x.shape
    hwf = pool_mat.shape[0]
    j = wmat.shape[1]
    return pl.pallas_call(
        _backbone_sample_kernel,
        out_shape=jax.ShapeDtypeStruct((b, j, C_FEAT), jnp.float32),
        grid=(b,),
        in_specs=[
            pl.BlockSpec((None, hw, cin), lambda i: (i, 0, 0)),
            pl.BlockSpec((cin, C_BB), lambda i: (0, 0)),
            pl.BlockSpec((1, C_BB), lambda i: (0, 0)),
            pl.BlockSpec((hwf, hw), lambda i: (0, 0)),
            pl.BlockSpec((C_BB, C_FEAT), lambda i: (0, 0)),
            pl.BlockSpec((1, C_FEAT), lambda i: (0, 0)),
            pl.BlockSpec((None, j, hwf), lambda i: (i, 0, 0)),
        ],
        out_specs=pl.BlockSpec((None, j, C_FEAT), lambda i: (i, 0, 0)),
        compiler_params=pltpu.CompilerParams(
            dimension_semantics=("parallel",),
            vmem_limit_bytes=32 * 1024 * 1024),
    )(x, bb_w, bb_b.reshape(1, C_BB), pool_mat, conv_w,
      conv_shift.reshape(1, C_FEAT), wmat)


def _fused_heads_kernel(x_ref, w_ref, b_ref, o_ref):
    # one lane-dense matmul for all four joint-feature heads
    acc = jnp.dot(x_ref[...], w_ref[...], preferred_element_type=jnp.float32)
    o_ref[...] = (acc + b_ref[...]).astype(o_ref.dtype)


def fused_heads_pallas(x_pad, w, b):
    n, din = x_pad.shape
    dout = w.shape[1]
    return pl.pallas_call(
        _fused_heads_kernel,
        out_shape=jax.ShapeDtypeStruct((n, dout), jnp.float32),
        grid=(1,),
        in_specs=[
            pl.BlockSpec((n, din), lambda i: (0, 0)),
            pl.BlockSpec((din, dout), lambda i: (0, 0)),
            pl.BlockSpec((1, dout), lambda i: (0, 0)),
        ],
        out_specs=pl.BlockSpec((n, dout), lambda i: (0, 0)),
        compiler_params=pltpu.CompilerParams(
            dimension_semantics=("arbitrary",)),
    )(x_pad, w, b.reshape(1, dout))


def _root_mlp_kernel(x_ref, w0_ref, b0_ref, w1_ref, b1_ref, o_ref):
    # both 2-layer root-trans MLPs in one pass; hidden stays on-chip
    h = jnp.dot(x_ref[...], w0_ref[...], preferred_element_type=jnp.float32)
    h = jnp.maximum(h + b0_ref[...], 0.0)                      # (B, 2*HIDDEN)
    out = jnp.dot(h, w1_ref[...], preferred_element_type=jnp.float32)
    o_ref[...] = (out + b1_ref[...]).astype(o_ref.dtype)


def root_mlp_pallas(x_pad, w0, b0, w1, b1):
    n, din = x_pad.shape
    dh = w0.shape[1]
    dout = w1.shape[1]
    return pl.pallas_call(
        _root_mlp_kernel,
        out_shape=jax.ShapeDtypeStruct((n, dout), jnp.float32),
        grid=(1,),
        in_specs=[
            pl.BlockSpec((n, din), lambda i: (0, 0)),
            pl.BlockSpec((din, dh), lambda i: (0, 0)),
            pl.BlockSpec((1, dh), lambda i: (0, 0)),
            pl.BlockSpec((dh, dout), lambda i: (0, 0)),
            pl.BlockSpec((1, dout), lambda i: (0, 0)),
        ],
        out_specs=pl.BlockSpec((n, dout), lambda i: (0, 0)),
        compiler_params=pltpu.CompilerParams(
            dimension_semantics=("arbitrary",)),
    )(x_pad, w0, b0.reshape(1, dh), w1, b1.reshape(1, dout))


# ----------------------------- JAX glue helpers ------------------------------
def build_pool_matrix(h, w):
    """Constant (HF*WF, H*W) matrix implementing a 2x2 average pool."""
    hf, wf = h // 2, w // 2
    p = np.zeros((hf * wf, h * w), np.float32)
    out_idx = np.arange(hf * wf)
    oy, ox = np.divmod(out_idx, wf)
    for dy in (0, 1):
        for dx in (0, 1):
            p[out_idx, (2 * oy + dy) * w + (2 * ox + dx)] = 0.25
    return jnp.asarray(p)


def bilinear_weights(joint_xy, h, w):
    """Dense (B, J, H*W) bilinear interpolation weights.

    Matches F.grid_sample(..., align_corners=True, padding_mode='zeros') with
    coords already in feature-map pixel space (as in sample_joint_features).
    # TODO(synk): at production feature-map sizes replace this dense weight
    # matmul with a scalar-prefetched 4-tap gather kernel."""
    x = joint_xy[..., 0]
    y = joint_xy[..., 1]
    x0 = jnp.floor(x)
    y0 = jnp.floor(y)
    x1 = x0 + 1.0
    y1 = y0 + 1.0
    wx1 = x - x0
    wx0 = 1.0 - wx1
    wy1 = y - y0
    wy0 = 1.0 - wy1

    def contrib(xi, yi, wt):
        valid = ((xi >= 0) & (xi <= w - 1) & (yi >= 0) & (yi <= h - 1))
        wt = wt * valid.astype(jnp.float32)
        xi_c = jnp.clip(xi, 0, w - 1).astype(jnp.int32)
        yi_c = jnp.clip(yi, 0, h - 1).astype(jnp.int32)
        idx = yi_c * w + xi_c                      # (B, J)
        onehot = jax.nn.one_hot(idx, h * w, dtype=jnp.float32)
        return onehot * wt[..., None]

    return (contrib(x0, y0, wx0 * wy0) + contrib(x1, y0, wx1 * wy0)
            + contrib(x0, y1, wx0 * wy1) + contrib(x1, y1, wx1 * wy1))


def _normalize(v, eps=1e-12):
    n = jnp.linalg.norm(v, axis=-1, keepdims=True)
    return v / jnp.maximum(n, eps)


def rotation_6d_to_matrix(d6):
    a1 = d6[..., :3]
    a2 = d6[..., 3:]
    b1 = _normalize(a1)
    b2 = _normalize(a2 - jnp.sum(b1 * a2, axis=-1, keepdims=True) * b1)
    b3 = jnp.cross(b1, b2)
    return jnp.stack((b1, b2, b3), axis=-2)


# ------------------------------ parameter init -------------------------------
def _uniform(key, shape, fan_in):
    bound = 1.0 / (fan_in ** 0.5)
    return jax.random.uniform(key, shape, jnp.float32, -bound, bound)


def init_params(key):
    keys = jax.random.split(key, 24)
    ki = iter(range(24))

    def lin(din, dout):
        w = _uniform(keys[next(ki)], (din, dout), din)
        b = _uniform(keys[next(ki)], (dout,), din)
        return w, b

    p = {}
    # TODO(synk): the real backbone is an external module (e.g. ResNet-50);
    # here it is a synthetic 1x1-conv + ReLU + 2x2 avg-pool stand-in.
    p['bb_w'], p['bb_b'] = lin(C_IN, C_BB)

    # self.conv = Conv2d(2048,512,1) + BatchNorm2d + ReLU (eval-mode BN),
    # with conv bias and BN affine folded into one weight/shift pair.
    conv_w, conv_b = lin(C_BB, C_FEAT)
    gamma = 1.0 + 0.1 * jax.random.normal(keys[next(ki)], (C_FEAT,), jnp.float32)
    beta = 0.1 * jax.random.normal(keys[next(ki)], (C_FEAT,), jnp.float32)
    running_mean = jnp.zeros((C_FEAT,), jnp.float32)
    running_var = jnp.ones((C_FEAT,), jnp.float32)
    bn_scale = gamma / jnp.sqrt(running_var + 1e-5)
    bn_shift = beta - running_mean * bn_scale
    p['conv_w_f'] = conv_w * bn_scale[None, :]
    p['conv_shift_f'] = conv_b * bn_scale + bn_shift

    # four heads reading joint_feat_flat, fused into one lane-dense matmul
    root_pose_w, root_pose_b = lin(D_JOINT, 6)
    hand_pose_w, hand_pose_b = lin(D_JOINT, (JOINT_NUM - 1) * 6)
    root_pose_code_w, root_pose_code_b = lin(D_JOINT, 6)
    pose_code_w, pose_code_b = lin(D_JOINT, POSE_CODE_DIM)
    w_cat = jnp.concatenate(
        [root_pose_w, hand_pose_w, root_pose_code_w, pose_code_w], axis=1)
    b_cat = jnp.concatenate(
        [root_pose_b, hand_pose_b, root_pose_code_b, pose_code_b], axis=0)
    p['heads_w'] = (jnp.zeros((D_JOINT_PAD, HEADS_OUT_PAD), jnp.float32)
                    .at[:D_JOINT, :HEADS_OUT].set(w_cat))
    p['heads_b'] = (jnp.zeros((HEADS_OUT_PAD,), jnp.float32)
                    .at[:HEADS_OUT].set(b_cat))

    # two 2-layer MLP heads on root_feat, fused:
    #   shared first-layer matmul (128 -> 256), block-diagonal second layer.
    rt_w0, rt_b0 = lin(D_ROOT, HIDDEN)
    rt_w1, rt_b1 = lin(HIDDEN, 3)
    rtc_w0, rtc_b0 = lin(D_ROOT, HIDDEN)
    rtc_w1, rtc_b1 = lin(HIDDEN, 3)
    w0 = jnp.zeros((D_ROOT_PAD, 2 * HIDDEN), jnp.float32)
    w0 = w0.at[:D_ROOT, :HIDDEN].set(rt_w0).at[:D_ROOT, HIDDEN:].set(rtc_w0)
    p['mlp_w0'] = w0
    p['mlp_b0'] = jnp.concatenate([rt_b0, rtc_b0], axis=0)
    w1 = jnp.zeros((2 * HIDDEN, MLP_OUT_PAD), jnp.float32)
    w1 = w1.at[:HIDDEN, 0:3].set(rt_w1).at[HIDDEN:, 3:6].set(rtc_w1)
    p['mlp_w1'] = w1
    p['mlp_b1'] = (jnp.zeros((MLP_OUT_PAD,), jnp.float32)
                   .at[0:3].set(rt_b1).at[3:6].set(rtc_b1))
    return p


# --------------------------------- forward -----------------------------------
@jax.jit
def posenet_forward(params, img, depthmap, mask, joint_img, img2bb_trans, id_code):
    batch_size = img.shape[0]

    # feat = cat((img, depthmap, mask), 1)  -- NCHW -> channels-last rows
    feat = jnp.concatenate([img, depthmap, mask], axis=1)
    b, cin, h, w = feat.shape
    hf, wf = h // 2, w // 2

    x = jnp.transpose(feat, (0, 2, 3, 1)).reshape(b, h * w, cin)
    pool_mat = build_pool_matrix(h, w)                        # compile-time const
    wmat = bilinear_weights(joint_img, hf, wf)                # (B, J, HF*WF)

    # fused: backbone conv+ReLU -> 2x2 avg pool -> conv/BN/ReLU -> grid_sample
    joint_feat = backbone_sample_pallas(
        x, params['bb_w'], params['bb_b'], pool_mat,
        params['conv_w_f'], params['conv_shift_f'], wmat)      # (B, J, C_FEAT)

    joint_feat = jnp.concatenate([joint_feat, joint_img], axis=2)  # (B, J, C+2)

    trans6 = img2bb_trans.reshape(batch_size, 6)
    root_feat = jnp.concatenate(
        [joint_feat[:, ROOT_JOINT_IDX, :], id_code, trans6], axis=1)   # (B, 80)
    joint_feat_flat = jnp.concatenate(
        [joint_feat.reshape(batch_size, -1), id_code, trans6], axis=1)  # (B, 542)

    # lane-align K for the MXU (zero-padded columns hit zero weight rows)
    jf_pad = jnp.pad(joint_feat_flat, ((0, 0), (0, D_JOINT_PAD - D_JOINT)))
    rf_pad = jnp.pad(root_feat, ((0, 0), (0, D_ROOT_PAD - D_ROOT)))

    # one fused lane-dense matmul for all four joint-feature heads
    heads = fused_heads_pallas(jf_pad, params['heads_w'], params['heads_b'])
    o1 = 6
    o2 = o1 + (JOINT_NUM - 1) * 6
    o3 = o2 + 6
    o4 = o3 + POSE_CODE_DIM
    root_pose = rotation_6d_to_matrix(heads[:, :o1])
    hand_pose = rotation_6d_to_matrix(
        heads[:, o1:o2].reshape(batch_size, JOINT_NUM - 1, 6))
    root_pose_for_code = rotation_6d_to_matrix(heads[:, o2:o3])
    pose_code = heads[:, o3:o4]

    # one fused kernel for both root-trans 2-layer MLPs
    mlp_out = root_mlp_pallas(rf_pad, params['mlp_w0'], params['mlp_b0'],
                              params['mlp_w1'], params['mlp_b1'])   # (B, 128)
    rt = mlp_out[:, 0:3]
    rtc = mlp_out[:, 3:6]
    root_trans = jnp.concatenate(
        [rt[:, :2], jax.nn.softplus(rt[:, 2:])], axis=1)
    root_trans_for_code = jnp.concatenate(
        [rtc[:, :2], jax.nn.softplus(rtc[:, 2:])], axis=1)

    return (root_pose, hand_pose, root_trans, root_pose_for_code, pose_code,
            root_trans_for_code)


# ----------------------------------- main -------------------------------------
if __name__ == "__main__":
    key = jax.random.PRNGKey(0)
    (k_param, k_img, k_depth, k_mask, k_joint, k_trans, k_id) = jax.random.split(key, 7)

    params = init_params(k_param)

    B = 2
    img = jax.random.normal(k_img, (B, 3, IMG_SIZE, IMG_SIZE), jnp.float32)
    depthmap = jax.random.normal(k_depth, (B, 1, IMG_SIZE, IMG_SIZE), jnp.float32)
    mask = (jax.random.uniform(k_mask, (B, 1, IMG_SIZE, IMG_SIZE)) > 0.5
            ).astype(jnp.float32)
    joint_img = jax.random.uniform(
        k_joint, (B, JOINT_NUM, 2), jnp.float32, 0.0, FEAT_SIZE - 1.0)
    img2bb_trans = jax.random.normal(k_trans, (B, 2, 3), jnp.float32)
    id_code = jax.random.normal(k_id, (B, ID_CODE_DIM), jnp.float32)

    outs = posenet_forward(params, img, depthmap, mask, joint_img,
                           img2bb_trans, id_code)
    outs = jax.block_until_ready(outs)

    root_pose, hand_pose, root_trans, root_pose_code, pose_code, root_trans_code = outs
    assert root_pose.shape == (B, 3, 3)
    assert hand_pose.shape == (B, JOINT_NUM - 1, 3, 3)
    assert root_trans.shape == (B, 3)
    assert root_pose_code.shape == (B, 3, 3)
    assert pose_code.shape == (B, POSE_CODE_DIM)
    assert root_trans_code.shape == (B, 3)
    assert all(bool(jnp.all(jnp.isfinite(o))) for o in outs)

    print("KERNEL_OK")
</pallas_src>

<mosaic_0001>
module attributes {stable_mosaic.version = 11 : i64} {
  func.func @_backbone_sample_kernel(%arg0: i32, %arg1: memref<1x256x5xf32, #tpu.memory_space<vmem>>, %arg2: memref<5x128xf32, #tpu.memory_space<vmem>>, %arg3: memref<1x128xf32, #tpu.memory_space<vmem>>, %arg4: memref<64x256xf32, #tpu.memory_space<vmem>>, %arg5: memref<128x64xf32, #tpu.memory_space<vmem>>, %arg6: memref<1x64xf32, #tpu.memory_space<vmem>>, %arg7: memref<1x8x64xf32, #tpu.memory_space<vmem>>, %arg8: memref<1x8x64xf32, #tpu.memory_space<vmem>>) attributes {dimension_semantics = [#tpu.dimension_semantics<parallel>], iteration_bounds = array<i64: 2>, scalar_prefetch = 0 : i64, scratch_operands = 0 : i64, tpu.core_type = #tpu.core_type<tc>, window_params = [{transform_indices = @transform_0, window_bounds = array<i64: 1, 256, 5>}, {pipeline_mode = #tpu.pipeline_mode<synchronous>, transform_indices = @transform_1, window_bounds = array<i64: 5, 128>}, {pipeline_mode = #tpu.pipeline_mode<synchronous>, transform_indices = @transform_2, window_bounds = array<i64: 1, 128>}, {pipeline_mode = #tpu.pipeline_mode<synchronous>, transform_indices = @transform_3, window_bounds = array<i64: 64, 256>}, {pipeline_mode = #tpu.pipeline_mode<synchronous>, transform_indices = @transform_4, window_bounds = array<i64: 128, 64>}, {pipeline_mode = #tpu.pipeline_mode<synchronous>, transform_indices = @transform_5, window_bounds = array<i64: 1, 64>}, {transform_indices = @transform_6, window_bounds = array<i64: 1, 8, 64>}, {transform_indices = @transform_7, window_bounds = array<i64: 1, 8, 64>}]} {
    %c0 = arith.constant 0 : index
    %c0_0 = arith.constant 0 : index
    %c0_1 = arith.constant 0 : index
    %0 = vector.load %arg1[%c0, %c0_0, %c0_1] : memref<1x256x5xf32, #tpu.memory_space<vmem>>, vector<1x256x5xf32>
    %1 = vector.shape_cast %0 : vector<1x256x5xf32> to vector<256x5xf32>
    %c0_2 = arith.constant 0 : index
    %c0_3 = arith.constant 0 : index
    %2 = vector.load %arg2[%c0_2, %c0_3] : memref<5x128xf32, #tpu.memory_space<vmem>>, vector<5x128xf32>
    %cst = arith.constant dense<0.000000e+00> : vector<256x128xf32>
    %3 = tpu.matmul %1, %2, %cst {dimension_numbers = #tpu.dot_dimension_numbers<[1], [0], [0], [1], [0, 0, 1, 1], [], []>} : vector<256x5xf32>, vector<5x128xf32>, vector<256x128xf32> -> vector<256x128xf32>
    %c0_4 = arith.constant 0 : index
    %c0_5 = arith.constant 0 : index
    %4 = vector.load %arg3[%c0_4, %c0_5] : memref<1x128xf32, #tpu.memory_space<vmem>>, vector<1x128xf32>
    %5 = vector.broadcast %4 : vector<1x128xf32> to vector<256x128xf32>
    %6 = arith.addf %3, %5 : vector<256x128xf32>
    %cst_6 = arith.constant 0.000000e+00 : f32
    %7 = vector.broadcast %cst_6 : f32 to vector<256x128xf32>
    %8 = arith.maximumf %6, %7 : vector<256x128xf32>
    %c0_7 = arith.constant 0 : index
    %c0_8 = arith.constant 0 : index
    %9 = vector.load %arg4[%c0_7, %c0_8] : memref<64x256xf32, #tpu.memory_space<vmem>>, vector<64x256xf32>
    %cst_9 = arith.constant dense<0.000000e+00> : vector<64x128xf32>
    %10 = tpu.matmul %9, %8, %cst_9 {dimension_numbers = #tpu.dot_dimension_numbers<[1], [0], [0], [1], [0, 0, 1, 1], [], []>} : vector<64x256xf32>, vector<256x128xf32>, vector<64x128xf32> -> vector<64x128xf32>
    %c0_10 = arith.constant 0 : index
    %c0_11 = arith.constant 0 : index
    %11 = vector.load %arg5[%c0_10, %c0_11] : memref<128x64xf32, #tpu.memory_space<vmem>>, vector<128x64xf32>
    %cst_12 = arith.constant dense<0.000000e+00> : vector<64x64xf32>
    %12 = tpu.matmul %10, %11, %cst_12 {dimension_numbers = #tpu.dot_dimension_numbers<[1], [0], [0], [1], [0, 0, 1, 1], [], []>} : vector<64x128xf32>, vector<128x64xf32>, vector<64x64xf32> -> vector<64x64xf32>
    %c0_13 = arith.constant 0 : index
    %c0_14 = arith.constant 0 : index
    %13 = vector.load %arg6[%c0_13, %c0_14] : memref<1x64xf32, #tpu.memory_space<vmem>>, vector<1x64xf32>
    %14 = vector.broadcast %13 : vector<1x64xf32> to vector<64x64xf32>
    %15 = arith.addf %12, %14 : vector<64x64xf32>
    %cst_15 = arith.constant 0.000000e+00 : f32
    %16 = vector.broadcast %cst_15 : f32 to vector<64x64xf32>
    %17 = arith.maximumf %15, %16 : vector<64x64xf32>
    %c0_16 = arith.constant 0 : index
    %c0_17 = arith.constant 0 : index
    %c0_18 = arith.constant 0 : index
    %18 = vector.load %arg7[%c0_16, %c0_17, %c0_18] : memref<1x8x64xf32, #tpu.memory_space<vmem>>, vector<1x8x64xf32>
    %19 = vector.shape_cast %18 : vector<1x8x64xf32> to vector<8x64xf32>
    %cst_19 = arith.constant dense<0.000000e+00> : vector<8x64xf32>
    %20 = tpu.matmul %19, %17, %cst_19 {dimension_numbers = #tpu.dot_dimension_numbers<[1], [0], [0], [1], [0, 0, 1, 1], [], []>} : vector<8x64xf32>, vector<64x64xf32>, vector<8x64xf32> -> vector<8x64xf32>
    %c0_20 = arith.constant 0 : index
    %c0_21 = arith.constant 0 : index
    %c0_22 = arith.constant 0 : index
    %21 = vector.load %arg8[%c0_20, %c0_21, %c0_22] : memref<1x8x64xf32, #tpu.memory_space<vmem>>, vector<1x8x64xf32>
    %22 = vector.shape_cast %21 : vector<1x8x64xf32> to vector<8x64xf32>
    %23 = vector.shape_cast %20 : vector<8x64xf32> to vector<1x8x64xf32>
    tpu.vector_store %arg8[%c0_20, %c0_21, %c0_22], %23 {strides = array<i32>} : memref<1x8x64xf32, #tpu.memory_space<vmem>>, vector<1x8x64xf32>,
    return
  }
  func.func @transform_0(%arg0: i32) -> (i32, i32, i32) {
    %c0_i32 = arith.constant 0 : i32
    %c0_i32_0 = arith.constant 0 : i32
    %c0_i32_1 = arith.constant 0 : i32
    return %arg0, %c0_i32, %c0_i32_0 : i32, i32, i32
  }
  func.func @transform_1(%arg0: i32) -> (i32, i32) {
    %c0_i32 = arith.constant 0 : i32
    %c0_i32_0 = arith.constant 0 : i32
    %c0_i32_1 = arith.constant 0 : i32
    return %c0_i32, %c0_i32_0 : i32, i32
  }
  func.func @transform_2(%arg0: i32) -> (i32, i32) {
    %c0_i32 = arith.constant 0 : i32
    %c0_i32_0 = arith.constant 0 : i32
    %c0_i32_1 = arith.constant 0 : i32
    return %c0_i32, %c0_i32_0 : i32, i32
  }
  func.func @transform_3(%arg0: i32) -> (i32, i32) {
    %c0_i32 = arith.constant 0 : i32
    %c0_i32_0 = arith.constant 0 : i32
    %c0_i32_1 = arith.constant 0 : i32
    return %c0_i32, %c0_i32_0 : i32, i32
  }
  func.func @transform_4(%arg0: i32) -> (i32, i32) {
    %c0_i32 = arith.constant 0 : i32
    %c0_i32_0 = arith.constant 0 : i32
    %c0_i32_1 = arith.constant 0 : i32
    return %c0_i32, %c0_i32_0 : i32, i32
  }
  func.func @transform_5(%arg0: i32) -> (i32, i32) {
    %c0_i32 = arith.constant 0 : i32
    %c0_i32_0 = arith.constant 0 : i32
    %c0_i32_1 = arith.constant 0 : i32
    return %c0_i32, %c0_i32_0 : i32, i32
  }
  func.func @transform_6(%arg0: i32) -> (i32, i32, i32) {
    %c0_i32 = arith.constant 0 : i32
    %c0_i32_0 = arith.constant 0 : i32
    %c0_i32_1 = arith.constant 0 : i32
    return %arg0, %c0_i32, %c0_i32_0 : i32, i32, i32
  }
  func.func @transform_7(%arg0: i32) -> (i32, i32, i32) {
    %c0_i32 = arith.constant 0 : i32
    %c0_i32_0 = arith.constant 0 : i32
    %c0_i32_1 = arith.constant 0 : i32
    return %arg0, %c0_i32, %c0_i32_0 : i32, i32, i32
  }
}

module attributes {stable_mosaic.version = 11 : i64} {
  func.func @_fused_heads_kernel(%arg0: i32, %arg1: memref<2x640xf32, #tpu.memory_space<vmem>>, %arg2: memref<640x128xf32, #tpu.memory_space<vmem>>, %arg3: memref<1x128xf32, #tpu.memory_space<vmem>>, %arg4: memref<2x128xf32, #tpu.memory_space<vmem>>) attributes {dimension_semantics = [#tpu.dimension_semantics<arbitrary>], iteration_bounds = array<i64: 1>, scalar_prefetch = 0 : i64, scratch_operands = 0 : i64, tpu.core_type = #tpu.core_type<tc>, window_params = [{pipeline_mode = #tpu.pipeline_mode<synchronous>, transform_indices = @transform_0, window_bounds = array<i64: 2, 640>}, {pipeline_mode = #tpu.pipeline_mode<synchronous>, transform_indices = @transform_1, window_bounds = array<i64: 640, 128>}, {pipeline_mode = #tpu.pipeline_mode<synchronous>, transform_indices = @transform_2, window_bounds = array<i64: 1, 128>}, {pipeline_mode = #tpu.pipeline_mode<synchronous>, transform_indices = @transform_3, window_bounds = array<i64: 2, 128>}]} {
    %c0 = arith.constant 0 : index
    %c0_0 = arith.constant 0 : index
    %0 = vector.load %arg1[%c0, %c0_0] : memref<2x640xf32, #tpu.memory_space<vmem>>, vector<2x640xf32>
    %c0_1 = arith.constant 0 : index
    %c0_2 = arith.constant 0 : index
    %1 = vector.load %arg2[%c0_1, %c0_2] : memref<640x128xf32, #tpu.memory_space<vmem>>, vector<640x128xf32>
    %cst = arith.constant dense<0.000000e+00> : vector<2x128xf32>
    %2 = tpu.matmul %0, %1, %cst {dimension_numbers = #tpu.dot_dimension_numbers<[1], [0], [0], [1], [0, 0, 1, 1], [], []>} : vector<2x640xf32>, vector<640x128xf32>, vector<2x128xf32> -> vector<2x128xf32>
    %c0_3 = arith.constant 0 : index
    %c0_4 = arith.constant 0 : index
    %3 = vector.load %arg3[%c0_3, %c0_4] : memref<1x128xf32, #tpu.memory_space<vmem>>, vector<1x128xf32>
    %4 = vector.broadcast %3 : vector<1x128xf32> to vector<2x128xf32>
    %5 = arith.addf %2, %4 : vector<2x128xf32>
    %c0_5 = arith.constant 0 : index
    %c0_6 = arith.constant 0 : index
    %6 = vector.load %arg4[%c0_5, %c0_6] : memref<2x128xf32, #tpu.memory_space<vmem>>, vector<2x128xf32>
    tpu.vector_store %arg4[%c0_5, %c0_6], %5 {strides = array<i32>} : memref<2x128xf32, #tpu.memory_space<vmem>>, vector<2x128xf32>,
    return
  }
  func.func @transform_0(%arg0: i32) -> (i32, i32) {
    %c0_i32 = arith.constant 0 : i32
    %c0_i32_0 = arith.constant 0 : i32
    %c0_i32_1 = arith.constant 0 : i32
    return %c0_i32, %c0_i32_0 : i32, i32
  }
  func.func @transform_1(%arg0: i32) -> (i32, i32) {
    %c0_i32 = arith.constant 0 : i32
    %c0_i32_0 = arith.constant 0 : i32
    %c0_i32_1 = arith.constant 0 : i32
    return %c0_i32, %c0_i32_0 : i32, i32
  }
  func.func @transform_2(%arg0: i32) -> (i32, i32) {
    %c0_i32 = arith.constant 0 : i32
    %c0_i32_0 = arith.constant 0 : i32
    %c0_i32_1 = arith.constant 0 : i32
    return %c0_i32, %c0_i32_0 : i32, i32
  }
  func.func @transform_3(%arg0: i32) -> (i32, i32) {
    %c0_i32 = arith.constant 0 : i32
    %c0_i32_0 = arith.constant 0 : i32
    %c0_i32_1 = arith.constant 0 : i32
    return %c0_i32, %c0_i32_0 : i32, i32
  }
}

module attributes {stable_mosaic.version = 11 : i64} {
  func.func @_root_mlp_kernel(%arg0: i32, %arg1: memref<2x128xf32, #tpu.memory_space<vmem>>, %arg2: memref<128x256xf32, #tpu.memory_space<vmem>>, %arg3: memref<1x256xf32, #tpu.memory_space<vmem>>, %arg4: memref<256x128xf32, #tpu.memory_space<vmem>>, %arg5: memref<1x128xf32, #tpu.memory_space<vmem>>, %arg6: memref<2x128xf32, #tpu.memory_space<vmem>>) attributes {dimension_semantics = [#tpu.dimension_semantics<arbitrary>], iteration_bounds = array<i64: 1>, scalar_prefetch = 0 : i64, scratch_operands = 0 : i64, tpu.core_type = #tpu.core_type<tc>, window_params = [{pipeline_mode = #tpu.pipeline_mode<synchronous>, transform_indices = @transform_0, window_bounds = array<i64: 2, 128>}, {pipeline_mode = #tpu.pipeline_mode<synchronous>, transform_indices = @transform_1, window_bounds = array<i64: 128, 256>}, {pipeline_mode = #tpu.pipeline_mode<synchronous>, transform_indices = @transform_2, window_bounds = array<i64: 1, 256>}, {pipeline_mode = #tpu.pipeline_mode<synchronous>, transform_indices = @transform_3, window_bounds = array<i64: 256, 128>}, {pipeline_mode = #tpu.pipeline_mode<synchronous>, transform_indices = @transform_4, window_bounds = array<i64: 1, 128>}, {pipeline_mode = #tpu.pipeline_mode<synchronous>, transform_indices = @transform_5, window_bounds = array<i64: 2, 128>}]} {
    %c0 = arith.constant 0 : index
    %c0_0 = arith.constant 0 : index
    %0 = vector.load %arg1[%c0, %c0_0] : memref<2x128xf32, #tpu.memory_space<vmem>>, vector<2x128xf32>
    %c0_1 = arith.constant 0 : index
    %c0_2 = arith.constant 0 : index
    %1 = vector.load %arg2[%c0_1, %c0_2] : memref<128x256xf32, #tpu.memory_space<vmem>>, vector<128x256xf32>
    %cst = arith.constant dense<0.000000e+00> : vector<2x256xf32>
    %2 = tpu.matmul %0, %1, %cst {dimension_numbers = #tpu.dot_dimension_numbers<[1], [0], [0], [1], [0, 0, 1, 1], [], []>} : vector<2x128xf32>, vector<128x256xf32>, vector<2x256xf32> -> vector<2x256xf32>
    %c0_3 = arith.constant 0 : index
    %c0_4 = arith.constant 0 : index
    %3 = vector.load %arg3[%c0_3, %c0_4] : memref<1x256xf32, #tpu.memory_space<vmem>>, vector<1x256xf32>
    %4 = vector.broadcast %3 : vector<1x256xf32> to vector<2x256xf32>
    %5 = arith.addf %2, %4 : vector<2x256xf32>
    %cst_5 = arith.constant 0.000000e+00 : f32
    %6 = vector.broadcast %cst_5 : f32 to vector<2x256xf32>
    %7 = arith.maximumf %5, %6 : vector<2x256xf32>
    %c0_6 = arith.constant 0 : index
    %c0_7 = arith.constant 0 : index
    %8 = vector.load %arg4[%c0_6, %c0_7] : memref<256x128xf32, #tpu.memory_space<vmem>>, vector<256x128xf32>
    %cst_8 = arith.constant dense<0.000000e+00> : vector<2x128xf32>
    %9 = tpu.matmul %7, %8, %cst_8 {dimension_numbers = #tpu.dot_dimension_numbers<[1], [0], [0], [1], [0, 0, 1, 1], [], []>} : vector<2x256xf32>, vector<256x128xf32>, vector<2x128xf32> -> vector<2x128xf32>
    %c0_9 = arith.constant 0 : index
    %c0_10 = arith.constant 0 : index
    %10 = vector.load %arg5[%c0_9, %c0_10] : memref<1x128xf32, #tpu.memory_space<vmem>>, vector<1x128xf32>
    %11 = vector.broadcast %10 : vector<1x128xf32> to vector<2x128xf32>
    %12 = arith.addf %9, %11 : vector<2x128xf32>
    %c0_11 = arith.constant 0 : index
    %c0_12 = arith.constant 0 : index
    %13 = vector.load %arg6[%c0_11, %c0_12] : memref<2x128xf32, #tpu.memory_space<vmem>>, vector<2x128xf32>
    tpu.vector_store %arg6[%c0_11, %c0_12], %12 {strides = array<i32>} : memref<2x128xf32, #tpu.memory_space<vmem>>, vector<2x128xf32>,
    return
  }
  func.func @transform_0(%arg0: i32) -> (i32, i32) {
    %c0_i32 = arith.constant 0 : i32
    %c0_i32_0 = arith.constant 0 : i32
    %c0_i32_1 = arith.constant 0 : i32
    return %c0_i32, %c0_i32_0 : i32, i32
  }
  func.func @transform_1(%arg0: i32) -> (i32, i32) {
    %c0_i32 = arith.constant 0 : i32
    %c0_i32_0 = arith.constant 0 : i32
    %c0_i32_1 = arith.constant 0 : i32
    return %c0_i32, %c0_i32_0 : i32, i32
  }
  func.func @transform_2(%arg0: i32) -> (i32, i32) {
    %c0_i32 = arith.constant 0 : i32
    %c0_i32_0 = arith.constant 0 : i32
    %c0_i32_1 = arith.constant 0 : i32
    return %c0_i32, %c0_i32_0 : i32, i32
  }
  func.func @transform_3(%arg0: i32) -> (i32, i32) {
    %c0_i32 = arith.constant 0 : i32
    %c0_i32_0 = arith.constant 0 : i32
    %c0_i32_1 = arith.constant 0 : i32
    return %c0_i32, %c0_i32_0 : i32, i32
  }
  func.func @transform_4(%arg0: i32) -> (i32, i32) {
    %c0_i32 = arith.constant 0 : i32
    %c0_i32_0 = arith.constant 0 : i32
    %c0_i32_1 = arith.constant 0 : i32
    return %c0_i32, %c0_i32_0 : i32, i32
  }
  func.func @transform_5(%arg0: i32) -> (i32, i32) {
    %c0_i32 = arith.constant 0 : i32
    %c0_i32_0 = arith.constant 0 : i32
    %c0_i32_1 = arith.constant 0 : i32
    return %c0_i32, %c0_i32_0 : i32, i32
  }
}

</mosaic_0001>

<bundles_post_ra>
// kernel: posenet_forward.4
= control target key start
LH: loop header
LB: loop body
LE: loop exit
PB: predicated region body
PF: predicated region fallthrough
CT: control target
= control target key end

     0   :  { %v566_v43 = vmov 1983009808   ;;  %v109_v45 = vlaneseq  ;;  %vm568_vm0 = vmmov 0   ;;  %s842_s1 = inlined_call_operand.vmem [shape: f32[640,128], index: 1, kind: input, shape index: {}]   ;;  %s843_s0 = inlined_call_operand.vmem [shape: f32[2,640], index: 0, kind: input, shape index: {}]   ;;  %s844_s2 = inlined_call_operand.vmem [shape: f32[1,128], index: 2, kind: input, shape index: {}]   ;;  %s845_s3 = inlined_call_operand.vmem [shape: f32[2,128], index: 3, kind: output, shape index: {}]  }
   0x1   :  { %v32_v0 = vld [vmem:[%s842_s1 + $0x80] sm:$0xff]  ;;  %v33_v1 = vld [vmem:[%s842_s1 + $0x88] sm:$0xff]  ;;  %v34_v11 = vld [vmem:[%s842_s1 + $0x90] sm:$0xff]  ;;  %v107_v44 = vunpack.c.l.s4 %v566_v43 }
   0x2   :  { %v16_v2 = vld [vmem:[%s842_s1] sm:$0xff]  ;;  %v473_v3 = vpack.c.bf16 %v33_v1, %v32_v0  ;;  %v17_v4 = vld [vmem:[%s842_s1 + $0x8] sm:$0xff]  ;;  %v35_v13 = vld [vmem:[%s842_s1 + $0x98] sm:$0xff]  ;;  %v110_v60 = vshrl.u32 %v109_v45, 7 }
   0x3   :  { %v64_v5 = vld [vmem:[%s842_s1 + $0x180] sm:$0xff]  ;;  %v65_v6 = vld [vmem:[%s842_s1 + $0x188] sm:$0xff]  ;;  %v475_v7 = vpack.c.bf16 %v17_v4, %v16_v2  ;;  %v18_v14 = vld [vmem:[%s842_s1 + $0x10] sm:$0xff]  ;;  %v477_v16 = vpack.c.bf16 %v35_v13, %v34_v11  ;;  %v108_v59 = vunpack.c.0.s8 %v107_v44 }
   0x4   :  { %v505_v8 = vpack.c.bf16 %v65_v6, %v64_v5  ;;  %v48_v9 = vld [vmem:[%s842_s1 + $0x100] sm:$0xff]  ;;  %v49_v10 = vld [vmem:[%s842_s1 + $0x108] sm:$0xff]  ;;  %474 = vmatprep.subr.bf16.mxu0 %v473_v3  ;;  %v19_v15 = vld [vmem:[%s842_s1 + $0x18] sm:$0xff] }
   0x5   :  { %v507_v12 = vpack.c.bf16 %v49_v10, %v48_v9  ;;  %476 = vmatpush3.bf16.msra.mxu0 %v475_v7  ;;  %v479_v17 = vpack.c.bf16 %v19_v15, %v18_v14  ;;  %v66_v18 = vld [vmem:[%s842_s1 + $0x190] sm:$0xff]  ;;  %v67_v19 = vld [vmem:[%s842_s1 + $0x198] sm:$0xff]  ;;  %v36_v23 = vld [vmem:[%s842_s1 + $0xa0] sm:$0xff]  ;;  %v111_v10 = vsub.s32 %v108_v59, %v110_v60 }
   0x6   :  { %506 = vmatprep.subr.bf16.mxu1 %v505_v8  ;;  %v50_v20 = vld [vmem:[%s842_s1 + $0x110] sm:$0xff]  ;;  %v509_v21 = vpack.c.bf16 %v67_v19, %v66_v18  ;;  %v51_v22 = vld [vmem:[%s842_s1 + $0x118] sm:$0xff]  ;;  %v37_v24 = vld [vmem:[%s842_s1 + $0xa8] sm:$0xff]  ;;  %478 = vmatprep.subr.bf16.mxu0 %v477_v16 }
   0x7   :  { %508 = vmatpush3.bf16.msra.mxu1 %v507_v12  ;;  %v511_v25 = vpack.c.bf16 %v51_v22, %v50_v20  ;;  %v481_v26 = vpack.c.bf16 %v37_v24, %v36_v23  ;;  %v20_v27 = vld [vmem:[%s842_s1 + $0x20] sm:$0xff]  ;;  %v21_v28 = vld [vmem:[%s842_s1 + $0x28] sm:$0xff]  ;;  %v38_v35 = vld [vmem:[%s842_s1 + $0xb0] sm:$0xff] }
   0x8   :  { %v68_v29 = vld [vmem:[%s842_s1 + $0x1a0] sm:$0xff]  ;;  %510 = vmatprep.subr.bf16.mxu1 %v509_v21  ;;  %v69_v30 = vld [vmem:[%s842_s1 + $0x1a8] sm:$0xff]  ;;  %v483_v33 = vpack.c.bf16 %v21_v28, %v20_v27  ;;  %v39_v36 = vld [vmem:[%s842_s1 + $0xb8] sm:$0xff] }
   0x9   :  { %v52_v31 = vld [vmem:[%s842_s1 + $0x120] sm:$0xff]  ;;  %v53_v32 = vld [vmem:[%s842_s1 + $0x128] sm:$0xff]  ;;  %480 = vmatpush3.bf16.msra.mxu0 %v479_v17  ;;  %v513_v34 = vpack.c.bf16 %v69_v30, %v68_v29  ;;  %v22_v37 = vld [vmem:[%s842_s1 + $0x30] sm:$0xff]  ;;  %v485_v39 = vpack.c.bf16 %v39_v36, %v38_v35 }
   0xa   :  { %482 = vmatprep.subr.bf16.mxu0 %v481_v26  ;;  %v515_v38 = vpack.c.bf16 %v53_v32, %v52_v31  ;;  %v23_v40 = vld [vmem:[%s842_s1 + $0x38] sm:$0xff]  ;;  %v70_v41 = vld [vmem:[%s842_s1 + $0x1b0] sm:$0xff]  ;;  %v40_v49 = vld [vmem:[%s842_s1 + $0xc0] sm:$0xff] }
   0xb   :  { %512 = vmatpush3.bf16.msra.mxu1 %v511_v25  ;;  %v71_v42 = vld [vmem:[%s842_s1 + $0x1b8] sm:$0xff]  ;;  %v54_v47 = vld [vmem:[%s842_s1 + $0x130] sm:$0xff]  ;;  %v41_v50 = vld [vmem:[%s842_s1 + $0xc8] sm:$0xff]  ;;  %v487_v51 = vpack.c.bf16 %v23_v40, %v22_v37 }
   0xc   :  { %514 = vmatprep.subr.bf16.mxu1 %v513_v34  ;;  %v517_v46 = vpack.c.bf16 %v71_v42, %v70_v41  ;;  %v55_v48 = vld [vmem:[%s842_s1 + $0x138] sm:$0xff]  ;;  %v72_v52 = vld [vmem:[%s842_s1 + $0x1c0] sm:$0xff]  ;;  %v73_v53 = vld [vmem:[%s842_s1 + $0x1c8] sm:$0xff]  ;;  %v489_v55 = vpack.c.bf16 %v41_v50, %v40_v49 }
   0xd   :  { %484 = vmatpush3.bf16.msra.mxu0 %v483_v33  ;;  %v519_v54 = vpack.c.bf16 %v55_v48, %v54_v47  ;;  %v24_v56 = vld [vmem:[%s842_s1 + $0x40] sm:$0xff]  ;;  %v25_v57 = vld [vmem:[%s842_s1 + $0x48] sm:$0xff]  ;;  %v521_v61 = vpack.c.bf16 %v73_v53, %v72_v52  ;;  %v42_v63 = vld [vmem:[%s842_s1 + $0xd0] sm:$0xff]  ;;  %v567_v47 = vmov 0.0|0.0   ;;  %v569_v53 = vmov 0.0  }
   0xe   :  { %486 = vmatprep.subr.bf16.mxu0 %v485_v39  ;;  %v56_v58 = vld [vmem:[%s842_s1 + $0x140] sm:$0xff]  ;;  %v57_v62 = vld [vmem:[%s842_s1 + $0x148] sm:$0xff]  ;;  %v43_v0 = vld [vmem:[%s842_s1 + $0xd8] sm:$0xff]  ;;  %v491_v3 = vpack.c.bf16 %v25_v57, %v24_v56 }
   0xf   :  { %516 = vmatpush3.bf16.msra.mxu1 %v515_v38  ;;  %v74_v1 = vld [vmem:[%s842_s1 + $0x1d0] sm:$0xff]  ;;  %v75_v2 = vld [vmem:[%s842_s1 + $0x1d8] sm:$0xff]  ;;  %v523_v5 = vpack.c.bf16 %v57_v62, %v56_v58  ;;  %v493_v6 = vpack.c.bf16 %v43_v0, %v42_v63  ;;  %v44_v12 = vld [vmem:[%s842_s1 + $0xe0] sm:$0xff] }
  0x10   :  { %518 = vmatprep.subr.bf16.mxu1 %v517_v46  ;;  %v26_v4 = vld [vmem:[%s842_s1 + $0x50] sm:$0xff]  ;;  %v27_v7 = vld [vmem:[%s842_s1 + $0x58] sm:$0xff]  ;;  %v525_v11 = vpack.c.bf16 %v75_v2, %v74_v1  ;;  %v45_v13 = vld [vmem:[%s842_s1 + $0xe8] sm:$0xff] }
  0x11   :  { %488 = vmatpush3.bf16.msra.mxu0 %v487_v51  ;;  %v58_v8 = vld [vmem:[%s842_s1 + $0x150] sm:$0xff]  ;;  %v59_v9 = vld [vmem:[%s842_s1 + $0x158] sm:$0xff]  ;;  %v76_v14 = vld [vmem:[%s842_s1 + $0x1e0] sm:$0xff]  ;;  %v495_v16 = vpack.c.bf16 %v27_v7, %v26_v4  ;;  %v497_v19 = vpack.c.bf16 %v45_v13, %v44_v12 }
  0x12   :  { %490 = vmatprep.subr.bf16.mxu0 %v489_v55  ;;  %v77_v15 = vld [vmem:[%s842_s1 + $0x1e8] sm:$0xff]  ;;  %v527_v17 = vpack.c.bf16 %v59_v9, %v58_v8  ;;  %v14_v18 = vld [vmem:[%s843_s0] sm:$0xff]  ;;  %v46_v27 = vld [vmem:[%s842_s1 + $0xf0] sm:$0xff] }
  0x13   :  { %520 = vmatpush3.bf16.msra.mxu1 %v519_v54  ;;  %v28_v20 = vld [vmem:[%s842_s1 + $0x60] sm:$0xff]  ;;  %v29_v21 = vld [vmem:[%s842_s1 + $0x68] sm:$0xff]  ;;  %v112_v23 = vrot.slane %v14_v18, %v111_v10  ;;  %v105_v24 = vcombine.high %v14_v18, %v14_v18  ;;  %v529_v25 = vpack.c.bf16 %v77_v15, %v76_v14  ;;  %v47_v28 = vld [vmem:[%s842_s1 + $0xf8] sm:$0xff] }
  0x14   :  { %522 = vmatprep.subr.bf16.mxu1 %v521_v61  ;;  %v60_v22 = vld [vmem:[%s842_s1 + $0x160] sm:$0xff]  ;;  %v61_v26 = vld [vmem:[%s842_s1 + $0x168] sm:$0xff]  ;;  %v78_v29 = vld [vmem:[%s842_s1 + $0x1f0] sm:$0xff]  ;;  %v499_v33 = vpack.c.bf16 %v29_v21, %v28_v20  ;;  %v501_v35 = vpack.c.bf16 %v47_v28, %v46_v27 }
  0x15   :  { %492 = vmatpush3.bf16.msra.mxu0 %v491_v3  ;;  %v79_v30 = vld [vmem:[%s842_s1 + $0x1f8] sm:$0xff]  ;;  %v120_v31 = vcombine.high %v112_v23, %v112_v23  ;;  %v119_v32 = vrot.slane %v105_v24, %v111_v10  ;;  %v531_v34 = vpack.c.bf16 %v61_v26, %v60_v22  ;;  %v30_v36 = vld [vmem:[%s842_s1 + $0x70] sm:$0xff]  ;;  %v80_v44 = vld [vmem:[%s842_s1 + $0x200] sm:$0xff] }
  0x16   :  { %494 = vmatprep.subr.bf16.mxu0 %v493_v6  ;;  %v31_v37 = vld [vmem:[%s842_s1 + $0x78] sm:$0xff]  ;;  %v533_v39 = vpack.c.bf16 %v79_v30, %v78_v29  ;;  %v62_v40 = vld [vmem:[%s842_s1 + $0x170] sm:$0xff]  ;;  %v81_v45 = vld [vmem:[%s842_s1 + $0x208] sm:$0xff] }
  0x17   :  { %524 = vmatpush3.bf16.msra.mxu1 %v523_v5  ;;  %v121_v38 = vcombine.high %v119_v32, %v119_v32  ;;  %198 = vmatprep.mubr.f32.mxu0 %v120_v31  ;;  %v63_v41 = vld [vmem:[%s842_s1 + $0x178] sm:$0xff]  ;;  %v503_v42 = vpack.c.bf16 %v31_v37, %v30_v36  ;;  %v538_v46 = vpack.c.bf16 %v81_v45, %v80_v44  ;;  %v82_v48 = vld [vmem:[%s842_s1 + $0x210] sm:$0xff]  ;;  %v84_v51 = vld [vmem:[%s842_s1 + $0x220] sm:$0xff] }
  0x18   :  { %526 = vmatprep.subr.bf16.mxu1 %v525_v11  ;;  %v535_v43 = vpack.c.bf16 %v63_v41, %v62_v40  ;;  %v83_v49 = vld [vmem:[%s842_s1 + $0x218] sm:$0xff]  ;;  %v85_v52 = vld [vmem:[%s842_s1 + $0x228] sm:$0xff]  ;;  %v86_v55 = vld [vmem:[%s842_s1 + $0x230] sm:$0xff] }
  0x19   :  { %496 = vmatpush3.bf16.msra.mxu0 %v495_v16  ;;  %268 = vmatprep.mubr.f32.mxu1 %v121_v38  ;;  %v541_v50 = vpack.c.bf16 %v83_v49, %v82_v48  ;;  %v544_v54 = vpack.c.bf16 %v85_v52, %v84_v51  ;;  %v87_v56 = vld [vmem:[%s842_s1 + $0x238] sm:$0xff]  ;;  %v88_v58 = vld [vmem:[%s842_s1 + $0x240] sm:$0xff]  ;;  %v89_v59 = vld [vmem:[%s842_s1 + $0x248] sm:$0xff] }
  0x1a   :  { %498 = vmatprep.subr.bf16.mxu0 %v497_v19  ;;  %v547_v57 = vpack.c.bf16 %v87_v56, %v86_v55  ;;  %v550_v60 = vpack.c.bf16 %v89_v59, %v88_v58  ;;  %v90_v61 = vld [vmem:[%s842_s1 + $0x250] sm:$0xff]  ;;  %v91_v62 = vld [vmem:[%s842_s1 + $0x258] sm:$0xff]  ;;  %v92_v0 = vld [vmem:[%s842_s1 + $0x260] sm:$0xff] }
  0x1b   :  { %528 = vmatpush3.bf16.msra.mxu1 %v527_v17  ;;  %v553_v63 = vpack.c.bf16 %v91_v62, %v90_v61  ;;  %v93_v1 = vld [vmem:[%s842_s1 + $0x268] sm:$0xff]  ;;  %v94_v3 = vld [vmem:[%s842_s1 + $0x270] sm:$0xff]  ;;  %v95_v4 = vld [vmem:[%s842_s1 + $0x278] sm:$0xff] }
  0x1c   :  { %530 = vmatprep.subr.bf16.mxu1 %v529_v25  ;;  %v556_v2 = vpack.c.bf16 %v93_v1, %v92_v0  ;;  %v559_v5 = vpack.c.bf16 %v95_v4, %v94_v3  ;;  %v350_v6 = vld.sshfl [vmem:[%s843_s0 + $0x8] sm:$0x3 pattern:$0x76325410]  ;;  %v349_v8 = vld [vmem:[%s844_s2] ss:$0 sm:$0xff] }
  0x1d   :  { %500 = vmatpush3.bf16.msra.mxu0 %v499_v33 }
  0x1e   :  { %502 = vmatprep.subr.bf16.mxu0 %v501_v35 }
  0x1f   :  { %532 = vmatpush3.bf16.msra.mxu1 %v531_v34 }
  0x20   :  { %534 = vmatprep.subr.bf16.mxu1 %v533_v39 }
  0x21   :  { %504 = vmatpush3.bf16.msra.mxu0 %v503_v42 }
  0x22   :  { %537 = vmatprep.subr.bf16.mxu0 %v567_v47 }
  0x23   :  { %536 = vmatpush3.bf16.msra.mxu1 %v535_v43 }
  0x24   :  { %199 = vmatmul.mubr.f32.vlgmr.msra.gmra.mrb[0].mxu0 %v112_v23 }
  0x25   :  { %539 = vmatpush3.bf16.msra.mxu0 %v538_v46  ;;  %470 = vmatprep.mubr.msk.f32.mxu0 %vm568_vm0, %v569_v53 }
  0x26   :  { %269 = vmatmul.mubr.f32.vlgmr.msra.gmra.mrb[0].mxu1 %v119_v32  ;;  %540 = vmatprep.subr.bf16.mxu0 %v567_v47 }
  0x29   :  { %542 = vmatpush3.bf16.msra.mxu0 %v541_v50 }
  0x2a   :  { %543 = vmatprep.subr.bf16.mxu0 %v567_v47 }
  0x2d   :  { %545 = vmatpush3.bf16.msra.mxu0 %v544_v54 }
  0x2e   :  { %546 = vmatprep.subr.bf16.mxu0 %v567_v47 }
  0x31   :  { %548 = vmatpush3.bf16.msra.mxu0 %v547_v57 }
  0x32   :  { %549 = vmatprep.subr.bf16.mxu0 %v567_v47 }
  0x35   :  { %551 = vmatpush3.bf16.msra.mxu0 %v550_v60 }
  0x36   :  { %552 = vmatprep.subr.bf16.mxu0 %v567_v47 }
  0x39   :  { %554 = vmatpush3.bf16.msra.mxu0 %v553_v63 }
  0x3a   :  { %555 = vmatprep.subr.bf16.mxu0 %v567_v47 }
  0x3d   :  { %557 = vmatpush3.bf16.msra.mxu0 %v556_v2 }
  0x3e   :  { %558 = vmatprep.subr.bf16.mxu0 %v567_v47 }
  0x41   :  { %560 = vmatpush3.bf16.msra.mxu0 %v559_v5 }
  0x44   :  { %471 = vmatmul.mubr.f32.vlgmr.msra.gmra.mrb[2].mxu0 %v350_v6 }
  0xf7   :  { %v383_v7 = vpop.f32.mrb[0].mxu0 }
  0xf8   :  { %v384_v9 = vpop.f32.mrb[1].mxu0 }
  0xf9   :  { %v418_v10 = vpop.f32.mrb[0].mxu1  ;;  %v385_v11 = vadd.f32 %v384_v9, %v383_v7 }
  0xfa   :  { %v419_v12 = vpop.f32.mrb[1].mxu1 }
  0xfb   :  { %v420_v13 = vadd.f32 %v419_v12, %v418_v10  ;;  %v201_v14 = vadd.f32 %v385_v11, %v349_v8 }
  0xfd   :  { %v271_v15 = vadd.f32 %v420_v13, %v201_v14 }
 0x117   :  { %v340_v16 = vpop.f32.mrb[2].mxu0 }
 0x118   :  { %v341_v17 = vadd.f32 %v340_v16, %v271_v15  ;;  %v472_v18 = vpop.f32.mrb[3].mxu0 }
 0x11a   :  { %344 = vst [vmem:[%s845_s3] sm:$0x3] %v341_v17 }

// kernel: posenet_forward.3
= control target key start
LH: loop header
LB: loop body
LE: loop exit
PB: predicated region body
PF: predicated region fallthrough
CT: control target
= control target key end

     0   :  { %s1511_s24 = smov 0   ;;  %s1761_s0 = inlined_call_operand.vmem [shape: f32[2,256,5], index: 0, kind: input, shape index: {}]   ;;  %s1762_s1 = inlined_call_operand.vmem [shape: f32[5,128], index: 1, kind: input, shape index: {}]   ;;  %s1763_s2 = inlined_call_operand.vmem [shape: f32[1,128], index: 2, kind: input, shape index: {}]   ;;  %s1764_s3 = inlined_call_operand.vmem [shape: f32[64,256], index: 3, kind: input, shape index: {}]   ;;  %s1765_s4 = inlined_call_operand.vmem [shape: f32[128,64], index: 4, kind: input, shape index: {}]   ;;  %s1766_s5 = inlined_call_operand.vmem [shape: f32[1,64], index: 5, kind: input, shape index: {}]   ;;  %s1767_s6 = inlined_call_operand.vmem [shape: f32[2,8,64], index: 6, kind: input, shape index: {}]   ;;  %s1768_s7 = inlined_call_operand.vmem [shape: f32[2,8,64], index: 7, kind: output, shape index: {}]  }
   0x1 LB: > { %s1090_s25 = sadd.s32 4294967295, %s1466_s24   ;;  %p1094_p0 = scmp.ge.s32.totalorder %s1466_s24, 1  ;;  %s1466_s24 = sphi %s1511_s24, %s17_s24  }
   0x2   : > { %p246_p1 = scmp.lt.s32.totalorder %s1466_s24, 3 }
   0x4   : > { %p247_p2 = pnand %p1094_p0, %p246_p1 }
   0x5   : > { %v326_v0 = vld [vmem:[%s1762_s1] sm:$0x1f] (!%p247_p2)  ;;  %vm431_vm0 = vcmask (!%p247_p2), 1044480   ;;  %p281_p3 = scmp.lt.s32.totalorder (!%p247_p2), %s1090_s25, 1  ;;  %vm334_vm1 = vcmask (!%p247_p2), 39936   ;;  %v693_v33 = vld [vmem:[%s1764_s3 + $0x8] sm:$0xff] (!%p247_p2) }
   0x6   : > { %250 = sbr.rel (%p247_p2) target bundleno = 979 (0x3d3), region = 48  ;;  %1260 = vmatprep.subr.msk.mxu0 (!%p247_p2), %vm431_vm0, %v326_v0  ;;  %772 = vmatprep.mubr.f32.mxu1 (!%p247_p2), %v693_v33  ;;  %v1600_v34 = vld [vmem:[%s1763_s2] ss:$0 sm:$0xff] (!%p247_p2)  ;;  %vm1469_vm2 = vmmov (!%p247_p2), 0   ;;  %vm950_vm3 = vcmask (!%p247_p2), 523264  }
   0x7   : > { %1261 = vmatpush3.msk.msra.mxu0 (!%p247_p2), %vm431_vm0, %v326_v0 }
   0xd   : > { %s1770_s25 = smov (!%p281_p3, %s1090_s25), 1 }
   0xe   : > { %s1137_s28 = sshll.u32 %s1770_s25, 8  ;;  %s1097_s14 = sshll.u32 %s1770_s25, 3 }
   0xf   : > { %s1528_s8 = scalar_lea.vmem %s1761_s0, %s1137_s28  ;;  %s289_s17 = scalar_lea.vmem %s1767_s6, %s1097_s14 }
  0x10   : > { %v294_v1 = vld [vmem:[%s1528_s8] sm:$0xff]  ;;  %v295_v2 = vld [vmem:[%s1528_s8 + $0x8] sm:$0xff]  ;;  %v296_v3 = vld [vmem:[%s1528_s8 + $0x10] sm:$0xff]  ;;  %s293_s20 = scalar_lea.vmem %s1768_s7, %s1097_s14 }
  0x11   : > { %1262 = vmatprep.mubr.msk.f32.mxu0 %vm334_vm1, %v294_v1  ;;  %v297_v4 = vld [vmem:[%s1528_s8 + $0x18] sm:$0xff]  ;;  %v298_v5 = vld [vmem:[%s1528_s8 + $0x20] sm:$0xff]  ;;  %v299_v6 = vld [vmem:[%s1528_s8 + $0x28] sm:$0xff] }
  0x12   : > { %1263 = vmatmul.mubr.msk.f32.vlgmr.msra.gmra.mrb[0].mxu0 %vm334_vm1, %v295_v2  ;;  %v300_v7 = vld [vmem:[%s1528_s8 + $0x30] sm:$0xff]  ;;  %v301_v8 = vld [vmem:[%s1528_s8 + $0x38] sm:$0xff]  ;;  %v302_v9 = vld [vmem:[%s1528_s8 + $0x40] sm:$0xff] }
  0x13   : > { %1265 = vmatprep.mubr.msk.f32.mxu0 %vm334_vm1, %v296_v3  ;;  %v303_v10 = vld [vmem:[%s1528_s8 + $0x48] sm:$0xff]  ;;  %v304_v11 = vld [vmem:[%s1528_s8 + $0x50] sm:$0xff]  ;;  %v305_v12 = vld [vmem:[%s1528_s8 + $0x58] sm:$0xff] }
  0x14   : > { %v306_v13 = vld [vmem:[%s1528_s8 + $0x60] sm:$0xff]  ;;  %v307_v14 = vld [vmem:[%s1528_s8 + $0x68] sm:$0xff]  ;;  %v308_v15 = vld [vmem:[%s1528_s8 + $0x70] sm:$0xff] }
  0x15   : > { %v309_v16 = vld [vmem:[%s1528_s8 + $0x78] sm:$0xff]  ;;  %v310_v17 = vld [vmem:[%s1528_s8 + $0x80] sm:$0xff]  ;;  %v311_v18 = vld [vmem:[%s1528_s8 + $0x88] sm:$0xff] }
  0x16   : > { %1266 = vmatmul.mubr.msk.f32.gmra.mrb[2].mxu0 %vm334_vm1, %v297_v4  ;;  %v312_v19 = vld [vmem:[%s1528_s8 + $0x90] sm:$0xff]  ;;  %v313_v20 = vld [vmem:[%s1528_s8 + $0x98] sm:$0xff]  ;;  %v314_v21 = vld [vmem:[%s1528_s8 + $0xa0] sm:$0xff] }
  0x17   : > { %1268 = vmatprep.mubr.msk.f32.mxu0 %vm334_vm1, %v298_v5  ;;  %v315_v22 = vld [vmem:[%s1528_s8 + $0xa8] sm:$0xff]  ;;  %v316_v23 = vld [vmem:[%s1528_s8 + $0xb0] sm:$0xff]  ;;  %v317_v24 = vld [vmem:[%s1528_s8 + $0xb8] sm:$0xff] }
  0x18   : > { %v318_v25 = vld [vmem:[%s1528_s8 + $0xc0] sm:$0xff]  ;;  %v319_v26 = vld [vmem:[%s1528_s8 + $0xc8] sm:$0xff]  ;;  %v320_v27 = vld [vmem:[%s1528_s8 + $0xd0] sm:$0xff] }
  0x19   : > { %v321_v28 = vld [vmem:[%s1528_s8 + $0xd8] sm:$0xff]  ;;  %v322_v29 = vld [vmem:[%s1528_s8 + $0xe0] sm:$0xff]  ;;  %v323_v30 = vld [vmem:[%s1528_s8 + $0xe8] sm:$0xff] }
  0x1a   : > { %1269 = vmatmul.mubr.msk.f32.gmra.mrb[4].mxu0 %vm334_vm1, %v299_v6  ;;  %v324_v31 = vld [vmem:[%s1528_s8 + $0xf0] sm:$0xff]  ;;  %v325_v32 = vld [vmem:[%s1528_s8 + $0xf8] sm:$0xff] }
  0x1b   : > { %1271 = vmatprep.mubr.msk.f32.mxu0 %vm334_vm1, %v300_v7 }
  0x1e   : > { %1272 = vmatmul.mubr.msk.f32.gmra.mrb[6].mxu0 %vm334_vm1, %v301_v8 }
  0x1f   : > { %1274 = vmatprep.mubr.msk.f32.mxu0 %vm334_vm1, %v302_v9 }
  0x22   : > { %1275 = vmatmul.mubr.msk.f32.gmra.mrb[8].mxu0 %vm334_vm1, %v303_v10 }
  0x23   : > { %1277 = vmatprep.mubr.msk.f32.mxu0 %vm334_vm1, %v304_v11 }
  0x26   : > { %1278 = vmatmul.mubr.msk.f32.gmra.mrb[10].mxu0 %vm334_vm1, %v305_v12 }
  0x27   : > { %1280 = vmatprep.mubr.msk.f32.mxu0 %vm334_vm1, %v306_v13 }
  0x2a   : > { %1281 = vmatmul.mubr.msk.f32.gmra.mrb[12].mxu0 %vm334_vm1, %v307_v14 }
  0x2b   : > { %1283 = vmatprep.mubr.msk.f32.mxu0 %vm334_vm1, %v308_v15 }
  0x2e   : > { %1284 = vmatmul.mubr.msk.f32.gmra.mrb[14].mxu0 %vm334_vm1, %v309_v16 }
  0x2f   : > { %1286 = vmatprep.mubr.msk.f32.mxu0 %vm334_vm1, %v310_v17 }
  0x32   : > { %1287 = vmatmul.mubr.msk.f32.gmra.mrb[16].mxu0 %vm334_vm1, %v311_v18 }
  0x33   : > { %1289 = vmatprep.mubr.msk.f32.mxu0 %vm334_vm1, %v312_v19 }
  0x36   : > { %1290 = vmatmul.mubr.msk.f32.gmra.mrb[18].mxu0 %vm334_vm1, %v313_v20 }
  0x37   : > { %1292 = vmatprep.mubr.msk.f32.mxu0 %vm334_vm1, %v314_v21 }
  0x3a   : > { %1293 = vmatmul.mubr.msk.f32.gmra.mrb[20].mxu0 %vm334_vm1, %v315_v22 }
  0x3b   : > { %1295 = vmatprep.mubr.msk.f32.mxu0 %vm334_vm1, %v316_v23 }
  0x3e   : > { %1296 = vmatmul.mubr.msk.f32.gmra.mrb[22].mxu0 %vm334_vm1, %v317_v24 }
  0x3f   : > { %1298 = vmatprep.mubr.msk.f32.mxu0 %vm334_vm1, %v318_v25 }
  0x42   : > { %1299 = vmatmul.mubr.msk.f32.gmra.mrb[24].mxu0 %vm334_vm1, %v319_v26 }
  0x43   : > { %1301 = vmatprep.mubr.msk.f32.mxu0 %vm334_vm1, %v320_v27 }
  0x46   : > { %1302 = vmatmul.mubr.msk.f32.gmra.mrb[26].mxu0 %vm334_vm1, %v321_v28 }
  0x47   : > { %1304 = vmatprep.mubr.msk.f32.mxu0 %vm334_vm1, %v322_v29 }
  0x4a   : > { %1305 = vmatmul.mubr.msk.f32.gmra.mrb[28].mxu0 %vm334_vm1, %v323_v30 }
  0x4b   : > { %1307 = vmatprep.mubr.msk.f32.mxu0 %vm334_vm1, %v324_v31 }
  0x4e   : > { %1308 = vmatmul.mubr.msk.f32.gmra.mrb[30].mxu0 %vm334_vm1, %v325_v32 }
  0xe5   : > { %v1264_v35 = vpop.f32.mrb[0].mxu0 }
  0xe6   : > { %v507_v36 = vadd.f32 %v1264_v35, %v1600_v34  ;;  %v501_v37 = vpop.f32.mrb[1].mxu0 }
  0xe7   : > { %v502_v38 = vadd.f32 %v1600_v34, %v501_v37 }
  0xe8   : > { %v661_v39 = vmax.f32 %v507_v36, 0.0 }
  0xe9   : > { %v660_v40 = vmax.f32 %v502_v38, 0.0  ;;  %v1267_v41 = vpop.f32.mrb[2].mxu0 }
  0xea   : > { %v517_v42 = vadd.f32 %v1267_v41, %v1600_v34  ;;  %v511_v43 = vpop.f32.mrb[3].mxu0 }
  0xeb   : > { %v512_v44 = vadd.f32 %v1600_v34, %v511_v43  ;;  %v1375_v45 = vpack.c.bf16 %v661_v39, %v660_v40 }
  0xec   : > { %v663_v46 = vmax.f32 %v517_v42, 0.0 }
  0xed   : > { %v662_v47 = vmax.f32 %v512_v44, 0.0  ;;  %v1270_v48 = vpop.f32.mrb[4].mxu0 }
  0xee   : > { %v527_v49 = vadd.f32 %v1270_v48, %v1600_v34  ;;  %v521_v50 = vpop.f32.mrb[5].mxu0 }
  0xef   : > { %v1607_v51 = vpack.c.bf16 %v663_v46, %v662_v47  ;;  %v522_v52 = vadd.f32 %v1600_v34, %v521_v50 }
  0xf0   : > { %v665_v53 = vmax.f32 %v527_v49, 0.0 }
  0xf1   : > { %v664_v54 = vmax.f32 %v522_v52, 0.0  ;;  %v1273_v55 = vpop.f32.mrb[6].mxu0 }
  0xf2   : > { %v537_v56 = vadd.f32 %v1273_v55, %v1600_v34  ;;  %v531_v57 = vpop.f32.mrb[7].mxu0 }
  0xf3   : > { %v1611_v58 = vpack.c.bf16 %v665_v53, %v664_v54  ;;  %v532_v59 = vadd.f32 %v1600_v34, %v531_v57 }
  0xf4   : > { %v667_v60 = vmax.f32 %v537_v56, 0.0 }
  0xf5   : > { %v666_v61 = vmax.f32 %v532_v59, 0.0  ;;  %v1276_v62 = vpop.f32.mrb[8].mxu0 }
  0xf6   : > { %v547_v63 = vadd.f32 %v1276_v62, %v1600_v34  ;;  %v541_v0 = vpop.f32.mrb[9].mxu0 }
  0xf7   : > { %v1615_v1 = vpack.c.bf16 %v667_v60, %v666_v61  ;;  %v542_v2 = vadd.f32 %v1600_v34, %v541_v0 }
  0xf8   : > { %v669_v3 = vmax.f32 %v547_v63, 0.0 }
  0xf9   : > { %v668_v4 = vmax.f32 %v542_v2, 0.0  ;;  %v1279_v5 = vpop.f32.mrb[10].mxu0 }
  0xfa   : > { %v557_v6 = vadd.f32 %v1279_v5, %v1600_v34  ;;  %v551_v7 = vpop.f32.mrb[11].mxu0 }
  0xfb   : > { %v1619_v8 = vpack.c.bf16 %v669_v3, %v668_v4  ;;  %v552_v9 = vadd.f32 %v1600_v34, %v551_v7 }
  0xfc   : > { %v671_v10 = vmax.f32 %v557_v6, 0.0 }
  0xfd   : > { %v670_v11 = vmax.f32 %v552_v9, 0.0  ;;  %v1282_v12 = vpop.f32.mrb[12].mxu0 }
  0xfe   : > { %v567_v13 = vadd.f32 %v1282_v12, %v1600_v34  ;;  %v561_v14 = vpop.f32.mrb[13].mxu0 }
  0xff   : > { %v1623_v15 = vpack.c.bf16 %v671_v10, %v670_v11  ;;  %v562_v16 = vadd.f32 %v1600_v34, %v561_v14 }
 0x100   : > { %v673_v17 = vmax.f32 %v567_v13, 0.0 }
 0x101   : > { %v672_v18 = vmax.f32 %v562_v16, 0.0  ;;  %v1285_v19 = vpop.f32.mrb[14].mxu0 }
 0x102   : > { %v577_v20 = vadd.f32 %v1285_v19, %v1600_v34  ;;  %v571_v21 = vpop.f32.mrb[15].mxu0 }
 0x103   : > { %v1627_v22 = vpack.c.bf16 %v673_v17, %v672_v18  ;;  %v572_v23 = vadd.f32 %v1600_v34, %v571_v21 }
 0x104   : > { %v675_v24 = vmax.f32 %v577_v20, 0.0  ;;  %v814_v20 = vld [vmem:[%s1765_s4 + $0x8] sm:$0xff] }
 0x105   : > { %v674_v25 = vmax.f32 %v572_v23, 0.0  ;;  %v1288_v26 = vpop.f32.mrb[16].mxu0 }
 0x106   : > { %v587_v27 = vadd.f32 %v1288_v26, %v1600_v34  ;;  %v581_v28 = vpop.f32.mrb[17].mxu0 }
 0x107   : > { %v1631_v29 = vpack.c.bf16 %v675_v24, %v674_v25  ;;  %v582_v30 = vadd.f32 %v1600_v34, %v581_v28  ;;  %v692_v25 = vld [vmem:[%s1764_s3] sm:$0xff]  ;;  %v818_v28 = vld [vmem:[%s1765_s4 + $0x28] sm:$0xff] }
 0x108   : > { %v677_v31 = vmax.f32 %v587_v27, 0.0  ;;  %v817_v27 = vld [vmem:[%s1765_s4 + $0x20] sm:$0xff] }
 0x109   : > { %v676_v32 = vmax.f32 %v582_v30, 0.0  ;;  %v1291_v33 = vpop.f32.mrb[18].mxu0  ;;  %v697_v30 = vld [vmem:[%s1764_s3 + $0x28] sm:$0xff] }
 0x10a   : > { %v597_v35 = vadd.f32 %v1291_v33, %v1600_v34  ;;  %v591_v36 = vpop.f32.mrb[19].mxu0  ;;  %v820_v33 = vld [vmem:[%s1765_s4 + $0x38] sm:$0xff] }
 0x10b   : > { %v592_v37 = vadd.f32 %v1600_v34, %v591_v36  ;;  %v1373_v38 = vpack.c.bf16 %v677_v31, %v676_v32  ;;  %v1413_v31 = vpack.c.bf16 %v818_v28, %v817_v27  ;;  %v819_v32 = vld [vmem:[%s1765_s4 + $0x30] sm:$0xff]  ;;  %v699_v36 = vld [vmem:[%s1764_s3 + $0x38] sm:$0xff] }
 0x10c   : > { %v679_v39 = vmax.f32 %v597_v35, 0.0  ;;  %v696_v35 = vld [vmem:[%s1764_s3 + $0x20] sm:$0xff] }
 0x10d   : > { %v678_v40 = vmax.f32 %v592_v37, 0.0  ;;  %v1294_v41 = vpop.f32.mrb[20].mxu0  ;;  %1374 = vmatprep.subr.bf16.mxu1 %v1373_v38  ;;  %v1417_v37 = vpack.c.bf16 %v820_v33, %v819_v32  ;;  %v821_v38 = vld [vmem:[%s1765_s4 + $0x40] sm:$0xff] }
 0x10e   : > { %v607_v42 = vadd.f32 %v1294_v41, %v1600_v34  ;;  %v601_v43 = vpop.f32.mrb[21].mxu0  ;;  %1376 = vmatpush3.bf16.msra.mxu1 %v1375_v45  ;;  %v701_v41 = vld [vmem:[%s1764_s3 + $0x48] sm:$0xff] }
 0x10f   : > { %v1377_v44 = vpack.c.bf16 %v679_v39, %v678_v40  ;;  %v602_v46 = vadd.f32 %v1600_v34, %v601_v43  ;;  %v822_v39 = vld [vmem:[%s1765_s4 + $0x48] sm:$0xff]  ;;  %v698_v40 = vld [vmem:[%s1764_s3 + $0x30] sm:$0xff] }
 0x110   : > { %v681_v47 = vmax.f32 %v607_v42, 0.0  ;;  %v1421_v42 = vpack.c.bf16 %v822_v39, %v821_v38  ;;  %v823_v43 = vld [vmem:[%s1765_s4 + $0x50] sm:$0xff] }
 0x111   : > { %v680_v48 = vmax.f32 %v602_v46, 0.0  ;;  %v1297_v49 = vpop.f32.mrb[22].mxu0  ;;  %1378 = vmatprep.subr.bf16.mxu1 %v1377_v44  ;;  %v824_v44 = vld [vmem:[%s1765_s4 + $0x58] sm:$0xff]  ;;  %v700_v46 = vld [vmem:[%s1764_s3 + $0x40] sm:$0xff] }
 0x112   : > { %v617_v50 = vadd.f32 %v1297_v49, %v1600_v34  ;;  %v611_v52 = vpop.f32.mrb[23].mxu0  ;;  %1380 = vmatpush3.bf16.msra.mxu1 %v1607_v51  ;;  %v702_v49 = vld [vmem:[%s1764_s3 + $0x50] sm:$0xff] }
 0x113   : > { %v1381_v53 = vpack.c.bf16 %v681_v47, %v680_v48  ;;  %v612_v54 = vadd.f32 %v1600_v34, %v611_v52  ;;  %v703_v47 = vld [vmem:[%s1764_s3 + $0x58] sm:$0xff]  ;;  %v1425_v48 = vpack.c.bf16 %v824_v44, %v823_v43  ;;  %v704_v52 = vld [vmem:[%s1764_s3 + $0x60] sm:$0xff] }
 0x114   : > { %v683_v55 = vmax.f32 %v617_v50, 0.0  ;;  %v705_v50 = vld [vmem:[%s1764_s3 + $0x68] sm:$0xff] }
 0x115   : > { %v682_v56 = vmax.f32 %v612_v54, 0.0  ;;  %v1300_v57 = vpop.f32.mrb[24].mxu0  ;;  %1382 = vmatprep.subr.bf16.mxu1 %v1381_v53  ;;  %v707_v53 = vld [vmem:[%s1764_s3 + $0x78] sm:$0xff]  ;;  %v706_v54 = vld [vmem:[%s1764_s3 + $0x70] sm:$0xff] }
 0x116   : > { %v627_v45 = vadd.f32 %v1300_v57, %v1600_v34  ;;  %v621_v59 = vpop.f32.mrb[25].mxu0  ;;  %1384 = vmatpush3.bf16.msra.mxu1 %v1611_v58 }
 0x117   : > { %v1385_v60 = vpack.c.bf16 %v683_v55, %v682_v56  ;;  %v622_v61 = vadd.f32 %v1600_v34, %v621_v59  ;;  %v825_v55 = vld [vmem:[%s1765_s4 + $0x60] sm:$0xff]  ;;  %v826_v56 = vld [vmem:[%s1765_s4 + $0x68] sm:$0xff]  ;;  %v828_v59 = vld [vmem:[%s1765_s4 + $0x78] sm:$0xff] }
 0x118   : > { %v685_v62 = vmax.f32 %v627_v45, 0.0  ;;  %v1429_v57 = vpack.c.bf16 %v826_v56, %v825_v55  ;;  %v827_v45 = vld [vmem:[%s1765_s4 + $0x70] sm:$0xff] }
 0x119   : > { %v684_v63 = vmax.f32 %v622_v61, 0.0  ;;  %v1303_v0 = vpop.f32.mrb[26].mxu0  ;;  %1386 = vmatprep.subr.bf16.mxu1 %v1385_v60  ;;  %v1433_v60 = vpack.c.bf16 %v828_v59, %v827_v45 }
 0x11a   : > { %v637_v51 = vadd.f32 %v1303_v0, %v1600_v34  ;;  %v631_v2 = vpop.f32.mrb[27].mxu0  ;;  %1388 = vmatpush3.bf16.msra.mxu1 %v1615_v1 }
 0x11b   : > { %v1389_v3 = vpack.c.bf16 %v685_v62, %v684_v63  ;;  %v632_v4 = vadd.f32 %v1600_v34, %v631_v2 }
 0x11c   : > { %v687_v5 = vmax.f32 %v637_v51, 0.0 }
 0x11d   : > { %v686_v6 = vmax.f32 %v632_v4, 0.0  ;;  %v1306_v7 = vpop.f32.mrb[28].mxu0  ;;  %1390 = vmatprep.subr.bf16.mxu1 %v1389_v3 }
 0x11e   : > { %v647_v58 = vadd.f32 %v1306_v7, %v1600_v34  ;;  %v641_v9 = vpop.f32.mrb[29].mxu0  ;;  %1392 = vmatpush3.bf16.msra.mxu1 %v1619_v8  ;;  %v813_v8 = vld [vmem:[%s1765_s4] sm:$0xff] }
 0x11f   : > { %v1393_v10 = vpack.c.bf16 %v687_v5, %v686_v6  ;;  %v642_v11 = vadd.f32 %v1600_v34, %v641_v9  ;;  %v1405_v24 = vpack.c.bf16 %v814_v20, %v813_v8  ;;  %v1468_v20 = vmov 0.0|0.0  }
 0x120   : > { %v689_v12 = vmax.f32 %v647_v58, 0.0  ;;  %1437 = vmatprep.subr.bf16.mxu0 %v1468_v20 }
 0x121   : > { %v688_v13 = vmax.f32 %v642_v11, 0.0  ;;  %v1309_v14 = vpop.f32.mrb[30].mxu0  ;;  %1394 = vmatprep.subr.bf16.mxu1 %v1393_v10 }
 0x122   : > { %v657_v1 = vadd.f32 %v1309_v14, %v1600_v34  ;;  %v651_v16 = vpop.f32.mrb[31].mxu0  ;;  %1396 = vmatpush3.bf16.msra.mxu1 %v1623_v15  ;;  %v815_v15 = vld [vmem:[%s1765_s4 + $0x10] sm:$0xff] }
 0x123   : > { %v1397_v17 = vpack.c.bf16 %v689_v12, %v688_v13  ;;  %v652_v18 = vadd.f32 %v1600_v34, %v651_v16  ;;  %v816_v34 = vld [vmem:[%s1765_s4 + $0x18] sm:$0xff] }
 0x124   : > { %v691_v19 = vmax.f32 %v657_v1, 0.0  ;;  %v1409_v26 = vpack.c.bf16 %v816_v34, %v815_v15 }
 0x125   : > { %v690_v21 = vmax.f32 %v652_v18, 0.0  ;;  %1398 = vmatprep.subr.bf16.mxu1 %v1397_v17 }
 0x126   : > { %1400 = vmatpush3.bf16.msra.mxu1 %v1627_v22  ;;  %v695_v22 = vld [vmem:[%s1764_s3 + $0x18] sm:$0xff] }
 0x127   : > { %v1401_v23 = vpack.c.bf16 %v691_v19, %v690_v21  ;;  %v1470_v21 = vmov 0.0  }
 0x128   : > { %1370 = vmatprep.mubr.msk.f32.mxu0 %vm1469_vm2, %v1470_v21 }
 0x129   : > { %1402 = vmatprep.subr.bf16.mxu1 %v1401_v23  ;;  %v1133_v23 = vld [vmem:[%s1766_s5] ss:$0 sm:$0xff] }
 0x12a   : > { %1404 = vmatpush3.bf16.msra.mxu1 %v1631_v29  ;;  %v694_v29 = vld [vmem:[%s1764_s3 + $0x10] sm:$0xff] }
 0x12b   : > { %1406 = vmatprep.subr.bf16.mxu1 %v1405_v24 }
 0x12d   : > { %773 = vmatmul.mubr.f32.vlgmr.msra.gmra.mrb[0].mxu1 %v692_v25 }
 0x12e   : > { %777 = vmatprep.mubr.f32.mxu1 %v695_v22  ;;  %1408 = vmatpush3.bf16.msra.mxu1 %v1405_v24 }
 0x12f   : > { %1410 = vmatprep.subr.bf16.mxu1 %v1409_v26 }
 0x131   : > { %778 = vmatmul.mubr.f32.gmra.mrb[2].mxu1 %v694_v29 }
 0x132   : > { %782 = vmatprep.mubr.f32.mxu1 %v697_v30  ;;  %1412 = vmatpush3.bf16.msra.mxu1 %v1409_v26 }
 0x133   : > { %1414 = vmatprep.subr.bf16.mxu1 %v1413_v31 }
 0x135   : > { %783 = vmatmul.mubr.f32.gmra.mrb[4].mxu1 %v696_v35 }
 0x136   : > { %787 = vmatprep.mubr.f32.mxu1 %v699_v36  ;;  %1416 = vmatpush3.bf16.msra.mxu1 %v1413_v31 }
 0x137   : > { %1418 = vmatprep.subr.bf16.mxu1 %v1417_v37 }
 0x139   : > { %788 = vmatmul.mubr.f32.gmra.mrb[6].mxu1 %v698_v40 }
 0x13a   : > { %792 = vmatprep.mubr.f32.mxu1 %v701_v41  ;;  %1420 = vmatpush3.bf16.msra.mxu1 %v1417_v37 }
 0x13b   : > { %1422 = vmatprep.subr.bf16.mxu1 %v1421_v42 }
 0x13d   : > { %793 = vmatmul.mubr.f32.gmra.mrb[8].mxu1 %v700_v46 }
 0x13e   : > { %797 = vmatprep.mubr.f32.mxu1 %v703_v47  ;;  %1424 = vmatpush3.bf16.msra.mxu1 %v1421_v42 }
 0x13f   : > { %1426 = vmatprep.subr.bf16.mxu1 %v1425_v48 }
 0x141   : > { %798 = vmatmul.mubr.f32.gmra.mrb[10].mxu1 %v702_v49 }
 0x142   : > { %802 = vmatprep.mubr.f32.mxu1 %v705_v50  ;;  %1428 = vmatpush3.bf16.msra.mxu1 %v1425_v48 }
 0x143   : > { %1430 = vmatprep.subr.bf16.mxu1 %v1429_v57 }
 0x145   : > { %803 = vmatmul.mubr.f32.gmra.mrb[12].mxu1 %v704_v52  ;;  %v949_v52 = vld [vmem:[%s289_s17] sm:$0xff] }
 0x146   : > { %807 = vmatprep.mubr.f32.mxu1 %v707_v53  ;;  %1432 = vmatpush3.bf16.msra.mxu1 %v1429_v57 }
 0x147   : > { %1434 = vmatprep.subr.bf16.mxu1 %v1433_v60 }
 0x149   : > { %808 = vmatmul.mubr.f32.gmra.mrb[14].mxu1 %v706_v54 }
 0x14a   : > { %1436 = vmatpush3.bf16.msra.mxu1 %v1433_v60 }
 0x200   : > { %v1203_v61 = vpop.f32.mrb[0].mxu1 }
 0x201   : > { %v1204_v62 = vpop.f32.mrb[1].mxu1 }
 0x202   : > { %v1205_v63 = vadd.f32 %v1204_v62, %v1203_v61 }
 0x204   : > { %v1206_v0 = vpop.f32.mrb[2].mxu1  ;;  %1342 = vmatprep.mubr.f32.mxu1 %v1205_v63 }
 0x205   : > { %v1207_v51 = vpop.f32.mrb[3].mxu1 }
 0x206   : > { %v1208_v2 = vadd.f32 %v1207_v51, %v1206_v0 }
 0x208   : > { %1343 = vmatmul.mubr.f32.vlgmr.msra.gmra.mrb[16].mxu1 %v1208_v2  ;;  %v1209_v3 = vpop.f32.mrb[4].mxu1 }
 0x209   : > { %v1210_v4 = vpop.f32.mrb[5].mxu1 }
 0x20a   : > { %v1211_v5 = vadd.f32 %v1210_v4, %v1209_v3 }
 0x20c   : > { %v1212_v6 = vpop.f32.mrb[6].mxu1  ;;  %1345 = vmatprep.mubr.f32.mxu1 %v1211_v5 }
 0x20d   : > { %v1213_v7 = vpop.f32.mrb[7].mxu1 }
 0x20e   : > { %v1214_v58 = vadd.f32 %v1213_v7, %v1212_v6 }
 0x210   : > { %1346 = vmatmul.mubr.f32.gmra.mrb[18].mxu1 %v1214_v58  ;;  %v1215_v9 = vpop.f32.mrb[8].mxu1 }
 0x211   : > { %v1216_v10 = vpop.f32.mrb[9].mxu1 }
 0x212   : > { %v1217_v11 = vadd.f32 %v1216_v10, %v1215_v9 }
 0x214   : > { %v1218_v12 = vpop.f32.mrb[10].mxu1  ;;  %1348 = vmatprep.mubr.f32.mxu1 %v1217_v11 }
 0x215   : > { %v1219_v13 = vpop.f32.mrb[11].mxu1 }
 0x216   : > { %v1220_v14 = vadd.f32 %v1219_v13, %v1218_v12 }
 0x218   : > { %1349 = vmatmul.mubr.f32.gmra.mrb[20].mxu1 %v1220_v14  ;;  %v1221_v1 = vpop.f32.mrb[12].mxu1 }
 0x219   : > { %v1222_v16 = vpop.f32.mrb[13].mxu1 }
 0x21a   : > { %v1223_v17 = vadd.f32 %v1222_v16, %v1221_v1 }
 0x21c   : > { %v1224_v18 = vpop.f32.mrb[14].mxu1  ;;  %1351 = vmatprep.mubr.f32.mxu1 %v1223_v17 }
 0x21d   : > { %v1225_v19 = vpop.f32.mrb[15].mxu1 }
 0x21e   : > { %v1226_v8 = vadd.f32 %v1225_v19, %v1224_v18 }
 0x220   : > { %1352 = vmatmul.mubr.f32.gmra.mrb[22].mxu1 %v1226_v8 }
 0x2db   : > { %v1344_v24 = vpop.f32.mrb[16].mxu1 }
 0x2dc   : > { %v908_v15 = vadd.f32 %v1344_v24, %v1133_v23  ;;  %v902_v34 = vpop.f32.mrb[17].mxu1 }
 0x2dd   : > { %v903_v25 = vadd.f32 %v1133_v23, %v902_v34 }
 0x2de   : > { %v942_v22 = vmax.f32 %v908_v15, 0.0 }
 0x2df   : > { %v941_v26 = vmax.f32 %v903_v25, 0.0 }
 0x2e1   : > { %v1438_v27 = vpack.c.bf16 %v942_v22, %v941_v26 }
 0x2e3   : > { %1439 = vmatpush3.bf16.msra.mxu0 %v1438_v27  ;;  %v1347_v28 = vpop.f32.mrb[18].mxu1 }
 0x2e4   : > { %v918_v29 = vadd.f32 %v1347_v28, %v1133_v23  ;;  %v912_v30 = vpop.f32.mrb[19].mxu1  ;;  %1440 = vmatprep.subr.bf16.mxu0 %v1468_v20 }
 0x2e5   : > { %v913_v31 = vadd.f32 %v1133_v23, %v912_v30 }
 0x2e6   : > { %v944_v32 = vmax.f32 %v918_v29, 0.0 }
 0x2e7   : > { %v943_v33 = vmax.f32 %v913_v31, 0.0 }
 0x2e9   : > { %v1441_v35 = vpack.c.bf16 %v944_v32, %v943_v33 }
 0x2eb   : > { %1442 = vmatpush3.bf16.msra.mxu0 %v1441_v35  ;;  %v1350_v36 = vpop.f32.mrb[20].mxu1 }
 0x2ec   : > { %v928_v37 = vadd.f32 %v1350_v36, %v1133_v23  ;;  %v922_v38 = vpop.f32.mrb[21].mxu1  ;;  %1443 = vmatprep.subr.bf16.mxu0 %v1468_v20 }
 0x2ed   : > { %v923_v39 = vadd.f32 %v1133_v23, %v922_v38 }
 0x2ee   : > { %v946_v40 = vmax.f32 %v928_v37, 0.0 }
 0x2ef   : > { %v945_v41 = vmax.f32 %v923_v39, 0.0 }
 0x2f1   : > { %v1444_v42 = vpack.c.bf16 %v946_v40, %v945_v41 }
 0x2f3   : > { %1445 = vmatpush3.bf16.msra.mxu0 %v1444_v42  ;;  %v1353_v43 = vpop.f32.mrb[22].mxu1 }
 0x2f4   : > { %v938_v44 = vadd.f32 %v1353_v43, %v1133_v23  ;;  %v932_v46 = vpop.f32.mrb[23].mxu1  ;;  %1446 = vmatprep.subr.bf16.mxu0 %v1468_v20 }
 0x2f5   : > { %v933_v47 = vadd.f32 %v1133_v23, %v932_v46 }
 0x2f6   : > { %v948_v48 = vmax.f32 %v938_v44, 0.0 }
 0x2f7   : > { %v947_v49 = vmax.f32 %v933_v47, 0.0 }
 0x2f9   : > { %v1447_v50 = vpack.c.bf16 %v948_v48, %v947_v49 }
 0x2fb   : > { %1448 = vmatpush3.bf16.msra.mxu0 %v1447_v50 }
 0x2fe   : > { %1371 = vmatmul.mubr.msk.f32.vlgmr.msra.gmra.mrb[32].mxu0 %vm950_vm3, %v949_v52 }
 0x3d1   : > { %v1020_v53 = vpop.f32.mrb[32].mxu0 }
 0x3d2   : > { %1024 = vst.msk [vmem:[%s293_s20] sm:$0xff] %vm950_vm3, %v1020_v53  ;;  %v1372_v54 = vpop.f32.mrb[33].mxu0 }
 0x3d3 PF: > { %s17_s24 = sadd.s32 1, %s1466_s24  }
 0x3d4   : > { %p14_p4 = scmp.ge.s32.totalorder %s17_s24, 4  }
 0x3d6   :  { %16 = sbr.rel (!%p14_p4) target bundleno = 1 (0x1), region = 81 }

// kernel: posenet_forward.5
= control target key start
LH: loop header
LB: loop body
LE: loop exit
PB: predicated region body
PF: predicated region fallthrough
CT: control target
= control target key end

     0   :  { %v353_v3 = vmov 0.0   ;;  %s588_s1 = inlined_call_operand.vmem [shape: f32[128,256], index: 1, kind: input, shape index: {}]   ;;  %s589_s3 = inlined_call_operand.vmem [shape: f32[256,128], index: 3, kind: input, shape index: {}]   ;;  %s590_s0 = inlined_call_operand.vmem [shape: f32[2,128], index: 0, kind: input, shape index: {}]   ;;  %s591_s2 = inlined_call_operand.vmem [shape: f32[1,256], index: 2, kind: input, shape index: {}]   ;;  %s592_s4 = inlined_call_operand.vmem [shape: f32[1,128], index: 4, kind: input, shape index: {}]   ;;  %s593_s5 = inlined_call_operand.vmem [shape: f32[2,128], index: 5, kind: output, shape index: {}]  }
   0x1   :  { %v22_v0 = vld [vmem:[%s588_s1 + $0x8] sm:$0xff]  ;;  %v24_v1 = vld [vmem:[%s588_s1 + $0x18] sm:$0xff]  ;;  %v21_v2 = vld [vmem:[%s588_s1] sm:$0xff]  ;;  %129 = vmatprep.mubr.f32.mxu0 %v353_v3 }
   0x2   :  { %v288_v4 = vpack.c.bf16 %v24_v1, %v22_v0  ;;  %v23_v5 = vld [vmem:[%s588_s1 + $0x10] sm:$0xff]  ;;  %v26_v6 = vld [vmem:[%s588_s1 + $0x28] sm:$0xff]  ;;  %v28_v7 = vld [vmem:[%s588_s1 + $0x38] sm:$0xff] }
   0x3   :  { %v290_v8 = vpack.c.bf16 %v23_v5, %v21_v2  ;;  %v292_v9 = vpack.c.bf16 %v28_v7, %v26_v6  ;;  %v25_v10 = vld [vmem:[%s588_s1 + $0x20] sm:$0xff]  ;;  %v27_v11 = vld [vmem:[%s588_s1 + $0x30] sm:$0xff]  ;;  %v30_v12 = vld [vmem:[%s588_s1 + $0x48] sm:$0xff] }
   0x4   :  { %289 = vmatprep.subr.bf16.mxu0 %v288_v4  ;;  %v32_v13 = vld [vmem:[%s588_s1 + $0x58] sm:$0xff]  ;;  %v294_v14 = vpack.c.bf16 %v27_v11, %v25_v10  ;;  %v29_v16 = vld [vmem:[%s588_s1 + $0x40] sm:$0xff]  ;;  %v31_v17 = vld [vmem:[%s588_s1 + $0x50] sm:$0xff] }
   0x5   :  { %291 = vmatpush1.bf16.msra.mxu0 %v290_v8  ;;  %v296_v15 = vpack.c.bf16 %v32_v13, %v30_v12  ;;  %v34_v18 = vld [vmem:[%s588_s1 + $0x68] sm:$0xff]  ;;  %v36_v19 = vld [vmem:[%s588_s1 + $0x78] sm:$0xff]  ;;  %v298_v20 = vpack.c.bf16 %v31_v17, %v29_v16  ;;  %v33_v22 = vld [vmem:[%s588_s1 + $0x60] sm:$0xff] }
   0x6   :  { %293 = vmatprep.subr.bf16.mxu0 %v292_v9  ;;  %v300_v21 = vpack.c.bf16 %v36_v19, %v34_v18  ;;  %v35_v23 = vld [vmem:[%s588_s1 + $0x70] sm:$0xff]  ;;  %v38_v24 = vld [vmem:[%s588_s1 + $0x88] sm:$0xff]  ;;  %v40_v25 = vld [vmem:[%s588_s1 + $0x98] sm:$0xff] }
   0x7   :  { %v37_v26 = vld [vmem:[%s588_s1 + $0x80] sm:$0xff]  ;;  %v39_v27 = vld [vmem:[%s588_s1 + $0x90] sm:$0xff]  ;;  %v155_v29 = vld [vmem:[%s589_s3 + $0x88] sm:$0xff]  ;;  %v302_v31 = vpack.c.bf16 %v35_v23, %v33_v22  ;;  %v304_v36 = vpack.c.bf16 %v40_v25, %v38_v24 }
   0x8   :  { %v154_v28 = vld [vmem:[%s589_s3 + $0x80] sm:$0xff]  ;;  %v139_v33 = vld [vmem:[%s589_s3 + $0x8] sm:$0xff]  ;;  %v156_v34 = vld [vmem:[%s589_s3 + $0x90] sm:$0xff]  ;;  %v306_v46 = vpack.c.bf16 %v39_v27, %v37_v26 }
   0x9   :  { %295 = vmatpush1.bf16.msra.mxu0 %v294_v14  ;;  %v138_v30 = vld [vmem:[%s589_s3] sm:$0xff]  ;;  %v320_v32 = vpack.c.bf16 %v155_v29, %v154_v28  ;;  %v157_v35 = vld [vmem:[%s589_s3 + $0x98] sm:$0xff]  ;;  %v140_v39 = vld [vmem:[%s589_s3 + $0x10] sm:$0xff] }
   0xa   :  { %297 = vmatprep.subr.bf16.mxu0 %v296_v15  ;;  %v322_v37 = vpack.c.bf16 %v139_v33, %v138_v30  ;;  %v324_v38 = vpack.c.bf16 %v157_v35, %v156_v34  ;;  %v141_v40 = vld [vmem:[%s589_s3 + $0x18] sm:$0xff]  ;;  %v158_v41 = vld [vmem:[%s589_s3 + $0xa0] sm:$0xff]  ;;  %v42_v42 = vld [vmem:[%s588_s1 + $0xa8] sm:$0xff]  ;;  %v55_v34 = vlaneseq }
   0xb   :  { %v44_v43 = vld [vmem:[%s588_s1 + $0xb8] sm:$0xff]  ;;  %321 = vmatprep.subr.bf16.mxu1 %v320_v32  ;;  %v159_v44 = vld [vmem:[%s589_s3 + $0xa8] sm:$0xff]  ;;  %v326_v45 = vpack.c.bf16 %v141_v40, %v140_v39  ;;  %v41_v47 = vld [vmem:[%s588_s1 + $0xa0] sm:$0xff] }
   0xc   :  { %323 = vmatpush3.bf16.msra.mxu1 %v322_v37  ;;  %v328_v48 = vpack.c.bf16 %v159_v44, %v158_v41  ;;  %v142_v49 = vld [vmem:[%s589_s3 + $0x20] sm:$0xff]  ;;  %v143_v50 = vld [vmem:[%s589_s3 + $0x28] sm:$0xff]  ;;  %v308_v51 = vpack.c.bf16 %v44_v43, %v42_v42  ;;  %v43_v52 = vld [vmem:[%s588_s1 + $0xb0] sm:$0xff]  ;;  %v56_v35 = vshrl.u32 %v55_v34, 7 }
   0xd   :  { %299 = vmatpush1.bf16.msra.mxu0 %v298_v20  ;;  %325 = vmatprep.subr.bf16.mxu1 %v324_v38  ;;  %v160_v53 = vld [vmem:[%s589_s3 + $0xb0] sm:$0xff]  ;;  %v161_v54 = vld [vmem:[%s589_s3 + $0xb8] sm:$0xff]  ;;  %v46_v55 = vld [vmem:[%s588_s1 + $0xc8] sm:$0xff]  ;;  %v330_v57 = vpack.c.bf16 %v143_v50, %v142_v49  ;;  %v310_v58 = vpack.c.bf16 %v43_v52, %v41_v47 }
   0xe   :  { %301 = vmatprep.subr.bf16.mxu0 %v300_v21  ;;  %v48_v56 = vld [vmem:[%s588_s1 + $0xd8] sm:$0xff]  ;;  %v45_v59 = vld [vmem:[%s588_s1 + $0xc0] sm:$0xff]  ;;  %v332_v60 = vpack.c.bf16 %v161_v54, %v160_v53  ;;  %v144_v61 = vld [vmem:[%s589_s3 + $0x30] sm:$0xff]  ;;  %v61_v38 = vsub.s32 1, %v56_v35 }
   0xf   :  { %v145_v62 = vld [vmem:[%s589_s3 + $0x38] sm:$0xff]  ;;  %v312_v63 = vpack.c.bf16 %v48_v56, %v46_v55  ;;  %v47_v0 = vld [vmem:[%s588_s1 + $0xd0] sm:$0xff]  ;;  %v162_v1 = vld [vmem:[%s589_s3 + $0xc0] sm:$0xff] }
  0x10   :  { %327 = vmatpush3.bf16.msra.mxu1 %v326_v45  ;;  %v163_v2 = vld [vmem:[%s589_s3 + $0xc8] sm:$0xff]  ;;  %v52_v4 = vld [vmem:[%s588_s1 + $0xf8] sm:$0xff]  ;;  %v334_v5 = vpack.c.bf16 %v145_v62, %v144_v61  ;;  %v314_v6 = vpack.c.bf16 %v47_v0, %v45_v59  ;;  %v49_v7 = vld [vmem:[%s588_s1 + $0xe0] sm:$0xff] }
  0x11   :  { %303 = vmatpush1.bf16.msra.mxu0 %v302_v31  ;;  %329 = vmatprep.subr.bf16.mxu1 %v328_v48  ;;  %v50_v3 = vld [vmem:[%s588_s1 + $0xe8] sm:$0xff]  ;;  %v336_v8 = vpack.c.bf16 %v163_v2, %v162_v1  ;;  %v146_v9 = vld [vmem:[%s589_s3 + $0x40] sm:$0xff]  ;;  %v51_v12 = vld [vmem:[%s588_s1 + $0xf0] sm:$0xff] }
  0x12   :  { %305 = vmatprep.subr.bf16.mxu0 %v304_v36  ;;  %v147_v10 = vld [vmem:[%s589_s3 + $0x48] sm:$0xff]  ;;  %v316_v11 = vpack.c.bf16 %v52_v4, %v50_v3  ;;  %v164_v13 = vld [vmem:[%s589_s3 + $0xd0] sm:$0xff]  ;;  %v165_v14 = vld [vmem:[%s589_s3 + $0xd8] sm:$0xff]  ;;  %v318_v16 = vpack.c.bf16 %v51_v12, %v49_v7  ;;  %v57_v36 = vsub.s32 0, %v56_v35 }
  0x13   :  { %v338_v15 = vpack.c.bf16 %v147_v10, %v146_v9  ;;  %v340_v17 = vpack.c.bf16 %v165_v14, %v164_v13  ;;  %v148_v18 = vld [vmem:[%s589_s3 + $0x50] sm:$0xff]  ;;  %v149_v19 = vld [vmem:[%s589_s3 + $0x58] sm:$0xff]  ;;  %v166_v20 = vld [vmem:[%s589_s3 + $0xe0] sm:$0xff] }
  0x14   :  { %331 = vmatpush3.bf16.msra.mxu1 %v330_v57  ;;  %v167_v21 = vld [vmem:[%s589_s3 + $0xe8] sm:$0xff]  ;;  %v342_v22 = vpack.c.bf16 %v149_v19, %v148_v18  ;;  %v20_v23 = vld [vmem:[%s590_s0] sm:$0x3]  ;;  %v168_v28 = vld [vmem:[%s589_s3 + $0xf0] sm:$0xff] }
  0x15   :  { %307 = vmatpush1.bf16.msra.mxu0 %v306_v46  ;;  %333 = vmatprep.subr.bf16.mxu1 %v332_v60  ;;  %v344_v24 = vpack.c.bf16 %v167_v21, %v166_v20  ;;  %v150_v25 = vld [vmem:[%s589_s3 + $0x60] sm:$0xff]  ;;  %v151_v26 = vld [vmem:[%s589_s3 + $0x68] sm:$0xff]  ;;  %v169_v29 = vld [vmem:[%s589_s3 + $0xf8] sm:$0xff] }
  0x16   :  { %309 = vmatprep.subr.bf16.mxu0 %v308_v51  ;;  %v346_v27 = vpack.c.bf16 %v151_v26, %v150_v25  ;;  %v348_v30 = vpack.c.bf16 %v169_v29, %v168_v28  ;;  %v152_v31 = vld [vmem:[%s589_s3 + $0x70] sm:$0xff]  ;;  %v153_v32 = vld [vmem:[%s589_s3 + $0x78] sm:$0xff]  ;;  %v53_v37 = vld [vmem:[%s591_s2] sm:$0x3] }
  0x17   :  { %v350_v33 = vpack.c.bf16 %v153_v32, %v152_v31  ;;  %v58_v39 = vrot.slane %v53_v37, %v57_v36  ;;  %v62_v40 = vrot.slane %v53_v37, %v61_v38  ;;  %v252_v48 = vld [vmem:[%s592_s4] ss:$0 sm:$0xff] }
  0x18   :  { %335 = vmatpush3.bf16.msra.mxu1 %v334_v5 }
  0x19   :  { %311 = vmatpush1.bf16.msra.mxu0 %v310_v58  ;;  %337 = vmatprep.subr.bf16.mxu1 %v336_v8 }
  0x1a   :  { %313 = vmatprep.subr.bf16.mxu0 %v312_v63 }
  0x1c   :  { %339 = vmatpush3.bf16.msra.mxu1 %v338_v15 }
  0x1d   :  { %315 = vmatpush1.bf16.msra.mxu0 %v314_v6  ;;  %341 = vmatprep.subr.bf16.mxu1 %v340_v17 }
  0x1e   :  { %317 = vmatprep.subr.bf16.mxu0 %v316_v11 }
  0x20   :  { %343 = vmatpush3.bf16.msra.mxu1 %v342_v22 }
  0x21   :  { %319 = vmatpush1.bf16.msra.mxu0 %v318_v16  ;;  %345 = vmatprep.subr.bf16.mxu1 %v344_v24 }
  0x24   :  { %130 = vmatmul.mubr.f32.vlgmr.msra.gmra.mrb[0].mxu0 %v20_v23  ;;  %347 = vmatpush3.bf16.msra.mxu1 %v346_v27 }
  0x25   :  { %349 = vmatprep.subr.bf16.mxu1 %v348_v30 }
  0x28   :  { %351 = vmatpush3.bf16.msra.mxu1 %v350_v33 }
  0xf7   :  { %v131_v41 = vpop.f32.mrb[0].mxu0 }
  0xf8   :  { %v132_v42 = vadd.f32 %v131_v41, %v58_v39  ;;  %v133_v43 = vpop.f32.mrb[1].mxu0 }
  0xf9   :  { %v134_v44 = vadd.f32 %v133_v43, %v62_v40 }
  0xfa   :  { %v136_v46 = vmax.f32 %v132_v42, 0.0 }
  0xfb   :  { %v137_v45 = vmax.f32 %v134_v44, 0.0 }
  0xfd   :  { %241 = vmatprep.mubr.f32.mxu1 %v137_v45 }
  0xfe   :  { %242 = vmatmul.mubr.f32.vlgmr.msra.gmra.mrb[0].mxu1 %v136_v46 }
 0x1d1   :  { %v285_v47 = vpop.f32.mrb[0].mxu1 }
 0x1d2   :  { %v286_v49 = vpop.f32.mrb[1].mxu1 }
 0x1d3   :  { %v287_v50 = vadd.f32 %v286_v49, %v285_v47 }
 0x1d5   :  { %v244_v51 = vadd.f32 %v287_v50, %v252_v48 }
 0x1d7   :  { %247 = vst [vmem:[%s593_s5] sm:$0x3] %v244_v51 }

</bundles_post_ra>
